<compile_context>
chip_gen: v7x
topology: tpu7x:2x2x1
jax: 0.10.0
libtpu: 0.0.40
codegen_flags: <defaults>
</compile_context>

<pallas_src>
import jax
import jax.numpy as jnp
from jax.experimental import pallas as pl
from jax.experimental.pallas import tpu as pltpu

START_TAG = "<START>"
STOP_TAG = "<STOP>"


def _make_kernel(T, B_tile, D_in, Hh, TAGS, start_ix, stop_ix):
    """Fused (batched) BiLSTM + hidden2tag + Viterbi-forward kernel."""
    H2 = 2 * Hh
    H6 = 6 * Hh
    H8 = 8 * Hh

    def kernel(xp_ref, wih_ref, whh_ref, b_ref, wtag_ref, btag_ref, trans_ref,
               feats_ref, bptrs_ref, score_ref, tag_ref):
        f32 = jnp.float32
        bf16 = jnp.bfloat16

        # ---- fused input projection: both directions, one MXU matmul ----
        # xp row (t*B_tile + b) = [x[b, t], x[b, T-1-t]]  (bf16)
        xg = jnp.dot(xp_ref[...], wih_ref[...],
                     preferred_element_type=f32) + b_ref[...]        # (T*Bt, 8Hh) f32

        whh = whh_ref[...]                                           # (2Hh, 8Hh) bf16

        # TODO(synk): PyTorch init_hidden() reads uninitialized CUDA memory; we use zeros.
        h = jnp.zeros((B_tile, H2), f32)      # [h_fwd | h_bwd]
        c = jnp.zeros((B_tile, H2), f32)      # [c_fwd | c_bwd]
        hs_f = [None] * T
        hs_b = [None] * T

        # ---- interleaved fwd/bwd recurrence (one combined step per t) ----
        for t in range(T):
            pre = xg[t * B_tile:(t + 1) * B_tile, :]                  # (Bt, 8Hh)
            gates = pre + jnp.dot(h.astype(bf16), whh,
                                  preferred_element_type=f32)         # (Bt, 8Hh)
            # column order: [i_f,i_b, f_f,f_b, o_f,o_b, g_f,g_b]
            sg = jax.nn.sigmoid(gates[:, :H6])                        # 1 EUP push
            gg = jnp.tanh(gates[:, H6:])                              # 1 EUP push
            i_g = sg[:, 0:H2]
            f_g = sg[:, H2:2 * H2]
            o_g = sg[:, 2 * H2:3 * H2]
            c = f_g * c + i_g * gg
            h = o_g * jnp.tanh(c)                                     # 1 EUP push
            hs_f[t] = h[:, :Hh]            # h_fwd(., t)
            hs_b[T - 1 - t] = h[:, Hh:]    # h_bwd(., T-1-t)

        # lstm_out row (t*Bt + b) = [h_fwd(b,t), h_bwd(b,t)]
        lstm_out = jnp.concatenate(
            [jnp.concatenate([hs_f[t], hs_b[t]], axis=1) for t in range(T)],
            axis=0)                                                   # (T*Bt, 2Hh)

        # ---- hidden2tag ----
        feats = jnp.dot(lstm_out.astype(bf16), wtag_ref[...],
                        preferred_element_type=f32) + btag_ref[...]   # (T*Bt, TAGS)
        feats_ref[...] = feats                                        # single store

        # ---- batched Viterbi forward DP (strictly f32) ----
        trans = trans_ref[...]                                        # (TAGS, TAGS) [next, prev]
        prev_i = jax.lax.broadcasted_iota(jnp.int32, (B_tile, TAGS), 1)
        prev_f = prev_i.astype(f32)
        fv = jnp.where(prev_i == start_ix, 0.0, -10000.0).astype(f32)  # (Bt, TAGS)

        bp_rows = []
        for t in range(T):
            vit_cols = []
            bp_cols = []
            for nt in range(TAGS):
                scr = fv + trans[nt:nt + 1, :]                        # (Bt, TAGS)
                best = jnp.max(scr, axis=1, keepdims=True)            # (Bt, 1)
                bp = jnp.min(jnp.where(scr == best, prev_f, float(TAGS)),
                             axis=1, keepdims=True)                   # first argmax
                vit_cols.append(best)
                bp_cols.append(bp)
            bp_rows.append(jnp.concatenate(bp_cols, axis=1))          # (Bt, TAGS)
            fv = jnp.concatenate(vit_cols, axis=1) + feats[t * B_tile:(t + 1) * B_tile, :]

        # single lane-contiguous writeback of all backpointers
        bptrs_ref[...] = jnp.concatenate(bp_rows, axis=0).astype(jnp.int32)

        terminal = fv + trans[stop_ix:stop_ix + 1, :]                 # (Bt, TAGS)
        path_score = jnp.max(terminal, axis=1, keepdims=True)         # (Bt, 1)
        best_tag = jnp.min(jnp.where(terminal == path_score, prev_f, float(TAGS)),
                           axis=1, keepdims=True)                     # (Bt, 1)
        score_ref[...] = path_score
        tag_ref[...] = best_tag.astype(jnp.int32)

    return kernel


def _place_gates(w_T, Hh, is_forward):
    """Permute 4*Hh gate columns (PyTorch order i,f,g,o) into the fused
    8*Hh layout [i_f,i_b, f_f,f_b, o_f,o_b, g_f,g_b], zero-filling the other
    direction's slots."""
    i_w = w_T[:, 0:Hh]
    f_w = w_T[:, Hh:2 * Hh]
    g_w = w_T[:, 2 * Hh:3 * Hh]
    o_w = w_T[:, 3 * Hh:4 * Hh]
    z = jnp.zeros_like(i_w)
    if is_forward:
        return jnp.concatenate([i_w, z, f_w, z, o_w, z, g_w, z], axis=1)
    return jnp.concatenate([z, i_w, z, f_w, z, o_w, z, g_w], axis=1)


def bilstm_crf_forward(word_ids, pos_ids, params, tag_to_ix, batch_tile=8):
    """Batched equivalent of BiLSTM_CRF.forward(sentence) -> (score, tag_seq).

    word_ids, pos_ids: (B, T) int arrays (B divisible by batch_tile)."""
    B, T = word_ids.shape
    assert B % batch_tile == 0
    G = B // batch_tile
    Hh = params["whh_f"].shape[1]
    TAGS = params["transitions"].shape[0]
    start_ix = tag_to_ix[START_TAG]
    stop_ix = tag_to_ix[STOP_TAG]

    # glue: embedding lookups + paired (fwd/bwd) activation slab
    x = jnp.concatenate([params["embed_word"][word_ids],
                         params["embed_pos"][pos_ids]], axis=-1).astype(jnp.float32)
    D_in = x.shape[-1]
    x_rev = x[:, ::-1, :]
    xp = jnp.concatenate([x, x_rev], axis=-1)                       # (B, T, 2*D_in)
    xp = (xp.reshape(G, batch_tile, T, 2 * D_in)
            .transpose(0, 2, 1, 3)                                  # (G, T, Bt, 2*D_in)
            .reshape(G * T * batch_tile, 2 * D_in)
            .astype(jnp.bfloat16))

    # glue: fused / permuted weight layouts (bf16 for MXU operands)
    wih_f_T = params["wih_f"].T                                     # (D_in, 4Hh)
    wih_b_T = params["wih_b"].T
    whh_f_T = params["whh_f"].T                                     # (Hh, 4Hh)
    whh_b_T = params["whh_b"].T
    wih_pair = jnp.concatenate([_place_gates(wih_f_T, Hh, True),
                                _place_gates(wih_b_T, Hh, False)],
                               axis=0).astype(jnp.bfloat16)         # (2*D_in, 8Hh)
    whh_pair = jnp.concatenate([_place_gates(whh_f_T, Hh, True),
                                _place_gates(whh_b_T, Hh, False)],
                               axis=0).astype(jnp.bfloat16)         # (2*Hh, 8Hh)
    b_f = (params["b_ih_f"] + params["b_hh_f"]).reshape(1, -1)
    b_b = (params["b_ih_b"] + params["b_hh_b"]).reshape(1, -1)
    b_pair = (_place_gates(b_f, Hh, True)
              + _place_gates(b_b, Hh, False)).astype(jnp.float32)   # (1, 8Hh)
    wtag_T = params["w_tag"].T.astype(jnp.bfloat16)                 # (2Hh, TAGS)
    btag = params["b_tag"].reshape(1, -1).astype(jnp.float32)
    trans = params["transitions"].astype(jnp.float32)

    kernel = _make_kernel(T, batch_tile, D_in, Hh, TAGS, start_ix, stop_ix)

    TB = T * batch_tile
    const = lambda g: (0, 0)
    tile0 = lambda g: (g, 0)

    feats_flat, bptrs_flat, score_flat, tag_flat = pl.pallas_call(
        kernel,
        grid=(G,),
        out_shape=(
            jax.ShapeDtypeStruct((G * TB, TAGS), jnp.float32),      # lstm_feats
            jax.ShapeDtypeStruct((G * TB, TAGS), jnp.int32),        # viterbi backpointers
            jax.ShapeDtypeStruct((G * batch_tile, 1), jnp.float32),  # path score
            jax.ShapeDtypeStruct((G * batch_tile, 1), jnp.int32),    # terminal best tag
        ),
        in_specs=[
            pl.BlockSpec((TB, 2 * D_in), tile0),                    # xp
            pl.BlockSpec((2 * D_in, 8 * Hh), const),                # wih_pair
            pl.BlockSpec((2 * Hh, 8 * Hh), const),                  # whh_pair
            pl.BlockSpec((1, 8 * Hh), const),                       # b_pair
            pl.BlockSpec((2 * Hh, TAGS), const),                    # wtag_T
            pl.BlockSpec((1, TAGS), const),                         # btag
            pl.BlockSpec((TAGS, TAGS), const),                      # transitions
        ],
        out_specs=(
            pl.BlockSpec((TB, TAGS), tile0),
            pl.BlockSpec((TB, TAGS), tile0),
            pl.BlockSpec((batch_tile, 1), tile0),
            pl.BlockSpec((batch_tile, 1), tile0),
        ),
        compiler_params=pltpu.CompilerParams(
            dimension_semantics=("parallel",)),
    )(xp, wih_pair, whh_pair, b_pair, wtag_T, btag, trans)

    # glue: undo the (grid, time, tile-batch) layout
    feats = (feats_flat.reshape(G, T, batch_tile, TAGS)
                       .transpose(0, 2, 1, 3).reshape(B, T, TAGS))
    bptrs = (bptrs_flat.reshape(G, T, batch_tile, TAGS)
                       .transpose(0, 2, 1, 3).reshape(B, T, TAGS))
    scores = score_flat.reshape(B)
    best_tags = tag_flat.reshape(B)

    # glue: Viterbi back-tracking (integer index chase over backpointers)
    def backtrack(best_tag, bptrs_bt):
        def back_step(tag, bp_t):
            new_tag = bp_t[tag]
            return new_tag, new_tag
        start_tag, ys = jax.lax.scan(back_step, best_tag, bptrs_bt, reverse=True)
        best_path = jnp.concatenate([ys[1:], best_tag[None]])
        return start_tag, best_path

    start_tags, best_paths = jax.vmap(backtrack)(best_tags, bptrs)
    return scores, best_paths, start_tags, feats


def init_params(key, vocab_size, embedding_dim, pos_dim, hidden_dim, tag_to_ix):
    """Deterministic synthetic parameters matching the PyTorch module's shapes."""
    E, P, H = embedding_dim, pos_dim, hidden_dim
    Hh = H // 2
    D_in = E + P
    TAGS = len(tag_to_ix)
    pos_size = 24
    ks = jax.random.split(key, 16)

    def u(k, shape, bound):
        return jax.random.uniform(k, shape, jnp.float32, -bound, bound)

    lstm_b = 1.0 / (Hh ** 0.5)
    lin_b = 1.0 / (H ** 0.5)

    params = {
        "embed_word": jax.random.normal(ks[0], (vocab_size + 2, E), jnp.float32),
        "embed_pos": jax.random.normal(ks[1], (pos_size, P), jnp.float32),
        "wih_f": u(ks[2], (4 * Hh, D_in), lstm_b),
        "whh_f": u(ks[3], (4 * Hh, Hh), lstm_b),
        "b_ih_f": u(ks[4], (4 * Hh,), lstm_b),
        "b_hh_f": u(ks[5], (4 * Hh,), lstm_b),
        "wih_b": u(ks[6], (4 * Hh, D_in), lstm_b),
        "whh_b": u(ks[7], (4 * Hh, Hh), lstm_b),
        "b_ih_b": u(ks[8], (4 * Hh,), lstm_b),
        "b_hh_b": u(ks[9], (4 * Hh,), lstm_b),
        "w_tag": u(ks[10], (TAGS, H), lin_b),
        "b_tag": u(ks[11], (TAGS,), lin_b),
    }
    transitions = jax.random.normal(ks[12], (TAGS, TAGS), jnp.float32)
    transitions = transitions.at[tag_to_ix[START_TAG], :].set(-10000.0)
    transitions = transitions.at[:, tag_to_ix[STOP_TAG]].set(-10000.0)
    params["transitions"] = transitions
    return params


if __name__ == "__main__":
    T = 8                      # sequence length
    B = 16                     # sentences (batched onto the grid)
    batch_tile = 8             # sentences per grid step
    embedding_dim = 16
    pos_dim = 8
    hidden_dim = 32
    vocab_size = 50
    tag_to_ix = {"B": 0, "I": 1, "O": 2, START_TAG: 3, STOP_TAG: 4}

    key = jax.random.PRNGKey(0)
    k_params, k_word, k_pos = jax.random.split(key, 3)

    params = init_params(k_params, vocab_size, embedding_dim, pos_dim,
                         hidden_dim, tag_to_ix)
    word_ids = jax.random.randint(k_word, (B, T), 0, vocab_size + 2)
    pos_ids = jax.random.randint(k_pos, (B, T), 0, 24)

    scores, tag_seqs, start_tags, feats = bilstm_crf_forward(
        word_ids, pos_ids, params, tag_to_ix, batch_tile=batch_tile)
    jax.block_until_ready((scores, tag_seqs, start_tags, feats))

    assert tag_seqs.shape == (B, T)
    assert scores.shape == (B,)
    # mirrors PyTorch's `assert start == self.tag_to_ix[START_TAG]` per sentence
    assert bool(jnp.all(start_tags == tag_to_ix[START_TAG]))
    assert bool(jnp.all(jnp.isfinite(feats)))
    print("KERNEL_OK")
</pallas_src>

<mosaic_0001>
module attributes {stable_mosaic.version = 11 : i64} {
  func.func @kernel(%arg0: i32, %arg1: memref<64x48xbf16, #tpu.memory_space<vmem>>, %arg2: memref<48x128xbf16, #tpu.memory_space<vmem>>, %arg3: memref<32x128xbf16, #tpu.memory_space<vmem>>, %arg4: memref<1x128xf32, #tpu.memory_space<vmem>>, %arg5: memref<32x5xbf16, #tpu.memory_space<vmem>>, %arg6: memref<1x5xf32, #tpu.memory_space<vmem>>, %arg7: memref<5x5xf32, #tpu.memory_space<vmem>>, %arg8: memref<64x5xf32, #tpu.memory_space<vmem>>, %arg9: memref<64x5xi32, #tpu.memory_space<vmem>>, %arg10: memref<8x1xf32, #tpu.memory_space<vmem>>, %arg11: memref<8x1xi32, #tpu.memory_space<vmem>>) attributes {dimension_semantics = [#tpu.dimension_semantics<parallel>], iteration_bounds = array<i64: 2>, scalar_prefetch = 0 : i64, scratch_operands = 0 : i64, tpu.core_type = #tpu.core_type<tc>, window_params = [{transform_indices = @transform_0, window_bounds = array<i64: 64, 48>}, {pipeline_mode = #tpu.pipeline_mode<synchronous>, transform_indices = @transform_1, window_bounds = array<i64: 48, 128>}, {pipeline_mode = #tpu.pipeline_mode<synchronous>, transform_indices = @transform_2, window_bounds = array<i64: 32, 128>}, {pipeline_mode = #tpu.pipeline_mode<synchronous>, transform_indices = @transform_3, window_bounds = array<i64: 1, 128>}, {pipeline_mode = #tpu.pipeline_mode<synchronous>, transform_indices = @transform_4, window_bounds = array<i64: 32, 5>}, {pipeline_mode = #tpu.pipeline_mode<synchronous>, transform_indices = @transform_5, window_bounds = array<i64: 1, 5>}, {pipeline_mode = #tpu.pipeline_mode<synchronous>, transform_indices = @transform_6, window_bounds = array<i64: 5, 5>}, {transform_indices = @transform_7, window_bounds = array<i64: 64, 5>}, {transform_indices = @transform_8, window_bounds = array<i64: 64, 5>}, {transform_indices = @transform_9, window_bounds = array<i64: 8, 1>}, {transform_indices = @transform_10, window_bounds = array<i64: 8, 1>}]} {
    %c0 = arith.constant 0 : index
    %c0_0 = arith.constant 0 : index
    %0 = vector.load %arg1[%c0, %c0_0] : memref<64x48xbf16, #tpu.memory_space<vmem>>, vector<64x48xbf16>
    %c0_1 = arith.constant 0 : index
    %c0_2 = arith.constant 0 : index
    %1 = vector.load %arg2[%c0_1, %c0_2] : memref<48x128xbf16, #tpu.memory_space<vmem>>, vector<48x128xbf16>
    %cst = arith.constant dense<0.000000e+00> : vector<64x128xf32>
    %2 = tpu.matmul %0, %1, %cst {dimension_numbers = #tpu.dot_dimension_numbers<[1], [0], [0], [1], [0, 0, 1, 1], [], []>} : vector<64x48xbf16>, vector<48x128xbf16>, vector<64x128xf32> -> vector<64x128xf32>
    %c0_3 = arith.constant 0 : index
    %c0_4 = arith.constant 0 : index
    %3 = vector.load %arg4[%c0_3, %c0_4] : memref<1x128xf32, #tpu.memory_space<vmem>>, vector<1x128xf32>
    %4 = vector.broadcast %3 : vector<1x128xf32> to vector<64x128xf32>
    %5 = arith.addf %2, %4 : vector<64x128xf32>
    %c0_5 = arith.constant 0 : index
    %c0_6 = arith.constant 0 : index
    %6 = vector.load %arg3[%c0_5, %c0_6] : memref<32x128xbf16, #tpu.memory_space<vmem>>, vector<32x128xbf16>
    %cst_7 = arith.constant 0.000000e+00 : f32
    %7 = vector.broadcast %cst_7 : f32 to vector<8x32xf32>
    %cst_8 = arith.constant 0.000000e+00 : f32
    %8 = vector.broadcast %cst_8 : f32 to vector<8x32xf32>
    %9 = vector.extract_strided_slice %5 {offsets = [0, 0], sizes = [8, 128], strides = [1, 1]} : vector<64x128xf32> to vector<8x128xf32>
    %10 = arith.truncf %7 : vector<8x32xf32> to vector<8x32xbf16>
    %cst_9 = arith.constant dense<0.000000e+00> : vector<8x128xf32>
    %11 = tpu.matmul %10, %6, %cst_9 {dimension_numbers = #tpu.dot_dimension_numbers<[1], [0], [0], [1], [0, 0, 1, 1], [], []>} : vector<8x32xbf16>, vector<32x128xbf16>, vector<8x128xf32> -> vector<8x128xf32>
    %12 = arith.addf %9, %11 : vector<8x128xf32>
    %13 = vector.extract_strided_slice %12 {offsets = [0, 0], sizes = [8, 96], strides = [1, 1]} : vector<8x128xf32> to vector<8x96xf32>
    %14 = arith.negf %13 : vector<8x96xf32>
    %15 = math.exp %14 : vector<8x96xf32>
    %cst_10 = arith.constant 1.000000e+00 : f32
    %16 = vector.broadcast %cst_10 : f32 to vector<8x96xf32>
    %17 = arith.addf %16, %15 : vector<8x96xf32>
    %18 = arith.divf %16, %17 : vector<8x96xf32>
    %19 = vector.extract_strided_slice %12 {offsets = [0, 96], sizes = [8, 32], strides = [1, 1]} : vector<8x128xf32> to vector<8x32xf32>
    %20 = math.tanh %19 : vector<8x32xf32>
    %21 = vector.extract_strided_slice %18 {offsets = [0, 0], sizes = [8, 32], strides = [1, 1]} : vector<8x96xf32> to vector<8x32xf32>
    %22 = vector.extract_strided_slice %18 {offsets = [0, 32], sizes = [8, 32], strides = [1, 1]} : vector<8x96xf32> to vector<8x32xf32>
    %23 = vector.extract_strided_slice %18 {offsets = [0, 64], sizes = [8, 32], strides = [1, 1]} : vector<8x96xf32> to vector<8x32xf32>
    %24 = arith.mulf %22, %8 : vector<8x32xf32>
    %25 = arith.mulf %21, %20 : vector<8x32xf32>
    %26 = arith.addf %24, %25 : vector<8x32xf32>
    %27 = math.tanh %26 : vector<8x32xf32>
    %28 = arith.mulf %23, %27 : vector<8x32xf32>
    %29 = vector.extract_strided_slice %28 {offsets = [0, 0], sizes = [8, 16], strides = [1, 1]} : vector<8x32xf32> to vector<8x16xf32>
    %30 = vector.extract_strided_slice %28 {offsets = [0, 16], sizes = [8, 16], strides = [1, 1]} : vector<8x32xf32> to vector<8x16xf32>
    %31 = vector.extract_strided_slice %5 {offsets = [8, 0], sizes = [8, 128], strides = [1, 1]} : vector<64x128xf32> to vector<8x128xf32>
    %32 = arith.truncf %28 : vector<8x32xf32> to vector<8x32xbf16>
    %cst_11 = arith.constant dense<0.000000e+00> : vector<8x128xf32>
    %33 = tpu.matmul %32, %6, %cst_11 {dimension_numbers = #tpu.dot_dimension_numbers<[1], [0], [0], [1], [0, 0, 1, 1], [], []>} : vector<8x32xbf16>, vector<32x128xbf16>, vector<8x128xf32> -> vector<8x128xf32>
    %34 = arith.addf %31, %33 : vector<8x128xf32>
    %35 = vector.extract_strided_slice %34 {offsets = [0, 0], sizes = [8, 96], strides = [1, 1]} : vector<8x128xf32> to vector<8x96xf32>
    %36 = arith.negf %35 : vector<8x96xf32>
    %37 = math.exp %36 : vector<8x96xf32>
    %cst_12 = arith.constant 1.000000e+00 : f32
    %38 = vector.broadcast %cst_12 : f32 to vector<8x96xf32>
    %39 = arith.addf %38, %37 : vector<8x96xf32>
    %40 = arith.divf %38, %39 : vector<8x96xf32>
    %41 = vector.extract_strided_slice %34 {offsets = [0, 96], sizes = [8, 32], strides = [1, 1]} : vector<8x128xf32> to vector<8x32xf32>
    %42 = math.tanh %41 : vector<8x32xf32>
    %43 = vector.extract_strided_slice %40 {offsets = [0, 0], sizes = [8, 32], strides = [1, 1]} : vector<8x96xf32> to vector<8x32xf32>
    %44 = vector.extract_strided_slice %40 {offsets = [0, 32], sizes = [8, 32], strides = [1, 1]} : vector<8x96xf32> to vector<8x32xf32>
    %45 = vector.extract_strided_slice %40 {offsets = [0, 64], sizes = [8, 32], strides = [1, 1]} : vector<8x96xf32> to vector<8x32xf32>
    %46 = arith.mulf %44, %26 : vector<8x32xf32>
    %47 = arith.mulf %43, %42 : vector<8x32xf32>
    %48 = arith.addf %46, %47 : vector<8x32xf32>
    %49 = math.tanh %48 : vector<8x32xf32>
    %50 = arith.mulf %45, %49 : vector<8x32xf32>
    %51 = vector.extract_strided_slice %50 {offsets = [0, 0], sizes = [8, 16], strides = [1, 1]} : vector<8x32xf32> to vector<8x16xf32>
    %52 = vector.extract_strided_slice %50 {offsets = [0, 16], sizes = [8, 16], strides = [1, 1]} : vector<8x32xf32> to vector<8x16xf32>
    %53 = vector.extract_strided_slice %5 {offsets = [16, 0], sizes = [8, 128], strides = [1, 1]} : vector<64x128xf32> to vector<8x128xf32>
    %54 = arith.truncf %50 : vector<8x32xf32> to vector<8x32xbf16>
    %cst_13 = arith.constant dense<0.000000e+00> : vector<8x128xf32>
    %55 = tpu.matmul %54, %6, %cst_13 {dimension_numbers = #tpu.dot_dimension_numbers<[1], [0], [0], [1], [0, 0, 1, 1], [], []>} : vector<8x32xbf16>, vector<32x128xbf16>, vector<8x128xf32> -> vector<8x128xf32>
    %56 = arith.addf %53, %55 : vector<8x128xf32>
    %57 = vector.extract_strided_slice %56 {offsets = [0, 0], sizes = [8, 96], strides = [1, 1]} : vector<8x128xf32> to vector<8x96xf32>
    %58 = arith.negf %57 : vector<8x96xf32>
    %59 = math.exp %58 : vector<8x96xf32>
    %cst_14 = arith.constant 1.000000e+00 : f32
    %60 = vector.broadcast %cst_14 : f32 to vector<8x96xf32>
    %61 = arith.addf %60, %59 : vector<8x96xf32>
    %62 = arith.divf %60, %61 : vector<8x96xf32>
    %63 = vector.extract_strided_slice %56 {offsets = [0, 96], sizes = [8, 32], strides = [1, 1]} : vector<8x128xf32> to vector<8x32xf32>
    %64 = math.tanh %63 : vector<8x32xf32>
    %65 = vector.extract_strided_slice %62 {offsets = [0, 0], sizes = [8, 32], strides = [1, 1]} : vector<8x96xf32> to vector<8x32xf32>
    %66 = vector.extract_strided_slice %62 {offsets = [0, 32], sizes = [8, 32], strides = [1, 1]} : vector<8x96xf32> to vector<8x32xf32>
    %67 = vector.extract_strided_slice %62 {offsets = [0, 64], sizes = [8, 32], strides = [1, 1]} : vector<8x96xf32> to vector<8x32xf32>
    %68 = arith.mulf %66, %48 : vector<8x32xf32>
    %69 = arith.mulf %65, %64 : vector<8x32xf32>
    %70 = arith.addf %68, %69 : vector<8x32xf32>
    %71 = math.tanh %70 : vector<8x32xf32>
    %72 = arith.mulf %67, %71 : vector<8x32xf32>
    %73 = vector.extract_strided_slice %72 {offsets = [0, 0], sizes = [8, 16], strides = [1, 1]} : vector<8x32xf32> to vector<8x16xf32>
    %74 = vector.extract_strided_slice %72 {offsets = [0, 16], sizes = [8, 16], strides = [1, 1]} : vector<8x32xf32> to vector<8x16xf32>
    %75 = vector.extract_strided_slice %5 {offsets = [24, 0], sizes = [8, 128], strides = [1, 1]} : vector<64x128xf32> to vector<8x128xf32>
    %76 = arith.truncf %72 : vector<8x32xf32> to vector<8x32xbf16>
    %cst_15 = arith.constant dense<0.000000e+00> : vector<8x128xf32>
    %77 = tpu.matmul %76, %6, %cst_15 {dimension_numbers = #tpu.dot_dimension_numbers<[1], [0], [0], [1], [0, 0, 1, 1], [], []>} : vector<8x32xbf16>, vector<32x128xbf16>, vector<8x128xf32> -> vector<8x128xf32>
    %78 = arith.addf %75, %77 : vector<8x128xf32>
    %79 = vector.extract_strided_slice %78 {offsets = [0, 0], sizes = [8, 96], strides = [1, 1]} : vector<8x128xf32> to vector<8x96xf32>
    %80 = arith.negf %79 : vector<8x96xf32>
    %81 = math.exp %80 : vector<8x96xf32>
    %cst_16 = arith.constant 1.000000e+00 : f32
    %82 = vector.broadcast %cst_16 : f32 to vector<8x96xf32>
    %83 = arith.addf %82, %81 : vector<8x96xf32>
    %84 = arith.divf %82, %83 : vector<8x96xf32>
    %85 = vector.extract_strided_slice %78 {offsets = [0, 96], sizes = [8, 32], strides = [1, 1]} : vector<8x128xf32> to vector<8x32xf32>
    %86 = math.tanh %85 : vector<8x32xf32>
    %87 = vector.extract_strided_slice %84 {offsets = [0, 0], sizes = [8, 32], strides = [1, 1]} : vector<8x96xf32> to vector<8x32xf32>
    %88 = vector.extract_strided_slice %84 {offsets = [0, 32], sizes = [8, 32], strides = [1, 1]} : vector<8x96xf32> to vector<8x32xf32>
    %89 = vector.extract_strided_slice %84 {offsets = [0, 64], sizes = [8, 32], strides = [1, 1]} : vector<8x96xf32> to vector<8x32xf32>
    %90 = arith.mulf %88, %70 : vector<8x32xf32>
    %91 = arith.mulf %87, %86 : vector<8x32xf32>
    %92 = arith.addf %90, %91 : vector<8x32xf32>
    %93 = math.tanh %92 : vector<8x32xf32>
    %94 = arith.mulf %89, %93 : vector<8x32xf32>
    %95 = vector.extract_strided_slice %94 {offsets = [0, 0], sizes = [8, 16], strides = [1, 1]} : vector<8x32xf32> to vector<8x16xf32>
    %96 = vector.extract_strided_slice %94 {offsets = [0, 16], sizes = [8, 16], strides = [1, 1]} : vector<8x32xf32> to vector<8x16xf32>
    %97 = vector.extract_strided_slice %5 {offsets = [32, 0], sizes = [8, 128], strides = [1, 1]} : vector<64x128xf32> to vector<8x128xf32>
    %98 = arith.truncf %94 : vector<8x32xf32> to vector<8x32xbf16>
    %cst_17 = arith.constant dense<0.000000e+00> : vector<8x128xf32>
    %99 = tpu.matmul %98, %6, %cst_17 {dimension_numbers = #tpu.dot_dimension_numbers<[1], [0], [0], [1], [0, 0, 1, 1], [], []>} : vector<8x32xbf16>, vector<32x128xbf16>, vector<8x128xf32> -> vector<8x128xf32>
    %100 = arith.addf %97, %99 : vector<8x128xf32>
    %101 = vector.extract_strided_slice %100 {offsets = [0, 0], sizes = [8, 96], strides = [1, 1]} : vector<8x128xf32> to vector<8x96xf32>
    %102 = arith.negf %101 : vector<8x96xf32>
    %103 = math.exp %102 : vector<8x96xf32>
    %cst_18 = arith.constant 1.000000e+00 : f32
    %104 = vector.broadcast %cst_18 : f32 to vector<8x96xf32>
    %105 = arith.addf %104, %103 : vector<8x96xf32>
    %106 = arith.divf %104, %105 : vector<8x96xf32>
    %107 = vector.extract_strided_slice %100 {offsets = [0, 96], sizes = [8, 32], strides = [1, 1]} : vector<8x128xf32> to vector<8x32xf32>
    %108 = math.tanh %107 : vector<8x32xf32>
    %109 = vector.extract_strided_slice %106 {offsets = [0, 0], sizes = [8, 32], strides = [1, 1]} : vector<8x96xf32> to vector<8x32xf32>
    %110 = vector.extract_strided_slice %106 {offsets = [0, 32], sizes = [8, 32], strides = [1, 1]} : vector<8x96xf32> to vector<8x32xf32>
    %111 = vector.extract_strided_slice %106 {offsets = [0, 64], sizes = [8, 32], strides = [1, 1]} : vector<8x96xf32> to vector<8x32xf32>
    %112 = arith.mulf %110, %92 : vector<8x32xf32>
    %113 = arith.mulf %109, %108 : vector<8x32xf32>
    %114 = arith.addf %112, %113 : vector<8x32xf32>
    %115 = math.tanh %114 : vector<8x32xf32>
    %116 = arith.mulf %111, %115 : vector<8x32xf32>
    %117 = vector.extract_strided_slice %116 {offsets = [0, 0], sizes = [8, 16], strides = [1, 1]} : vector<8x32xf32> to vector<8x16xf32>
    %118 = vector.extract_strided_slice %116 {offsets = [0, 16], sizes = [8, 16], strides = [1, 1]} : vector<8x32xf32> to vector<8x16xf32>
    %119 = vector.extract_strided_slice %5 {offsets = [40, 0], sizes = [8, 128], strides = [1, 1]} : vector<64x128xf32> to vector<8x128xf32>
    %120 = arith.truncf %116 : vector<8x32xf32> to vector<8x32xbf16>
    %cst_19 = arith.constant dense<0.000000e+00> : vector<8x128xf32>
    %121 = tpu.matmul %120, %6, %cst_19 {dimension_numbers = #tpu.dot_dimension_numbers<[1], [0], [0], [1], [0, 0, 1, 1], [], []>} : vector<8x32xbf16>, vector<32x128xbf16>, vector<8x128xf32> -> vector<8x128xf32>
    %122 = arith.addf %119, %121 : vector<8x128xf32>
    %123 = vector.extract_strided_slice %122 {offsets = [0, 0], sizes = [8, 96], strides = [1, 1]} : vector<8x128xf32> to vector<8x96xf32>
    %124 = arith.negf %123 : vector<8x96xf32>
    %125 = math.exp %124 : vector<8x96xf32>
    %cst_20 = arith.constant 1.000000e+00 : f32
    %126 = vector.broadcast %cst_20 : f32 to vector<8x96xf32>
    %127 = arith.addf %126, %125 : vector<8x96xf32>
    %128 = arith.divf %126, %127 : vector<8x96xf32>
    %129 = vector.extract_strided_slice %122 {offsets = [0, 96], sizes = [8, 32], strides = [1, 1]} : vector<8x128xf32> to vector<8x32xf32>
    %130 = math.tanh %129 : vector<8x32xf32>
    %131 = vector.extract_strided_slice %128 {offsets = [0, 0], sizes = [8, 32], strides = [1, 1]} : vector<8x96xf32> to vector<8x32xf32>
    %132 = vector.extract_strided_slice %128 {offsets = [0, 32], sizes = [8, 32], strides = [1, 1]} : vector<8x96xf32> to vector<8x32xf32>
    %133 = vector.extract_strided_slice %128 {offsets = [0, 64], sizes = [8, 32], strides = [1, 1]} : vector<8x96xf32> to vector<8x32xf32>
    %134 = arith.mulf %132, %114 : vector<8x32xf32>
    %135 = arith.mulf %131, %130 : vector<8x32xf32>
    %136 = arith.addf %134, %135 : vector<8x32xf32>
    %137 = math.tanh %136 : vector<8x32xf32>
    %138 = arith.mulf %133, %137 : vector<8x32xf32>
    %139 = vector.extract_strided_slice %138 {offsets = [0, 0], sizes = [8, 16], strides = [1, 1]} : vector<8x32xf32> to vector<8x16xf32>
    %140 = vector.extract_strided_slice %138 {offsets = [0, 16], sizes = [8, 16], strides = [1, 1]} : vector<8x32xf32> to vector<8x16xf32>
    %141 = vector.extract_strided_slice %5 {offsets = [48, 0], sizes = [8, 128], strides = [1, 1]} : vector<64x128xf32> to vector<8x128xf32>
    %142 = arith.truncf %138 : vector<8x32xf32> to vector<8x32xbf16>
    %cst_21 = arith.constant dense<0.000000e+00> : vector<8x128xf32>
    %143 = tpu.matmul %142, %6, %cst_21 {dimension_numbers = #tpu.dot_dimension_numbers<[1], [0], [0], [1], [0, 0, 1, 1], [], []>} : vector<8x32xbf16>, vector<32x128xbf16>, vector<8x128xf32> -> vector<8x128xf32>
    %144 = arith.addf %141, %143 : vector<8x128xf32>
    %145 = vector.extract_strided_slice %144 {offsets = [0, 0], sizes = [8, 96], strides = [1, 1]} : vector<8x128xf32> to vector<8x96xf32>
    %146 = arith.negf %145 : vector<8x96xf32>
    %147 = math.exp %146 : vector<8x96xf32>
    %cst_22 = arith.constant 1.000000e+00 : f32
    %148 = vector.broadcast %cst_22 : f32 to vector<8x96xf32>
    %149 = arith.addf %148, %147 : vector<8x96xf32>
    %150 = arith.divf %148, %149 : vector<8x96xf32>
    %151 = vector.extract_strided_slice %144 {offsets = [0, 96], sizes = [8, 32], strides = [1, 1]} : vector<8x128xf32> to vector<8x32xf32>
    %152 = math.tanh %151 : vector<8x32xf32>
    %153 = vector.extract_strided_slice %150 {offsets = [0, 0], sizes = [8, 32], strides = [1, 1]} : vector<8x96xf32> to vector<8x32xf32>
    %154 = vector.extract_strided_slice %150 {offsets = [0, 32], sizes = [8, 32], strides = [1, 1]} : vector<8x96xf32> to vector<8x32xf32>
    %155 = vector.extract_strided_slice %150 {offsets = [0, 64], sizes = [8, 32], strides = [1, 1]} : vector<8x96xf32> to vector<8x32xf32>
    %156 = arith.mulf %154, %136 : vector<8x32xf32>
    %157 = arith.mulf %153, %152 : vector<8x32xf32>
    %158 = arith.addf %156, %157 : vector<8x32xf32>
    %159 = math.tanh %158 : vector<8x32xf32>
    %160 = arith.mulf %155, %159 : vector<8x32xf32>
    %161 = vector.extract_strided_slice %160 {offsets = [0, 0], sizes = [8, 16], strides = [1, 1]} : vector<8x32xf32> to vector<8x16xf32>
    %162 = vector.extract_strided_slice %160 {offsets = [0, 16], sizes = [8, 16], strides = [1, 1]} : vector<8x32xf32> to vector<8x16xf32>
    %163 = vector.extract_strided_slice %5 {offsets = [56, 0], sizes = [8, 128], strides = [1, 1]} : vector<64x128xf32> to vector<8x128xf32>
    %164 = arith.truncf %160 : vector<8x32xf32> to vector<8x32xbf16>
    %cst_23 = arith.constant dense<0.000000e+00> : vector<8x128xf32>
    %165 = tpu.matmul %164, %6, %cst_23 {dimension_numbers = #tpu.dot_dimension_numbers<[1], [0], [0], [1], [0, 0, 1, 1], [], []>} : vector<8x32xbf16>, vector<32x128xbf16>, vector<8x128xf32> -> vector<8x128xf32>
    %166 = arith.addf %163, %165 : vector<8x128xf32>
    %167 = vector.extract_strided_slice %166 {offsets = [0, 0], sizes = [8, 96], strides = [1, 1]} : vector<8x128xf32> to vector<8x96xf32>
    %168 = arith.negf %167 : vector<8x96xf32>
    %169 = math.exp %168 : vector<8x96xf32>
    %cst_24 = arith.constant 1.000000e+00 : f32
    %170 = vector.broadcast %cst_24 : f32 to vector<8x96xf32>
    %171 = arith.addf %170, %169 : vector<8x96xf32>
    %172 = arith.divf %170, %171 : vector<8x96xf32>
    %173 = vector.extract_strided_slice %166 {offsets = [0, 96], sizes = [8, 32], strides = [1, 1]} : vector<8x128xf32> to vector<8x32xf32>
    %174 = math.tanh %173 : vector<8x32xf32>
    %175 = vector.extract_strided_slice %172 {offsets = [0, 0], sizes = [8, 32], strides = [1, 1]} : vector<8x96xf32> to vector<8x32xf32>
    %176 = vector.extract_strided_slice %172 {offsets = [0, 32], sizes = [8, 32], strides = [1, 1]} : vector<8x96xf32> to vector<8x32xf32>
    %177 = vector.extract_strided_slice %172 {offsets = [0, 64], sizes = [8, 32], strides = [1, 1]} : vector<8x96xf32> to vector<8x32xf32>
    %178 = arith.mulf %176, %158 : vector<8x32xf32>
    %179 = arith.mulf %175, %174 : vector<8x32xf32>
    %180 = arith.addf %178, %179 : vector<8x32xf32>
    %181 = math.tanh %180 : vector<8x32xf32>
    %182 = arith.mulf %177, %181 : vector<8x32xf32>
    %183 = vector.extract_strided_slice %182 {offsets = [0, 0], sizes = [8, 16], strides = [1, 1]} : vector<8x32xf32> to vector<8x16xf32>
    %184 = vector.extract_strided_slice %182 {offsets = [0, 16], sizes = [8, 16], strides = [1, 1]} : vector<8x32xf32> to vector<8x16xf32>
    %185 = tpu.concatenate %29, %184 in 1 : vector<8x16xf32>, vector<8x16xf32> -> vector<8x32xf32>
    %186 = tpu.concatenate %51, %162 in 1 : vector<8x16xf32>, vector<8x16xf32> -> vector<8x32xf32>
    %187 = tpu.concatenate %73, %140 in 1 : vector<8x16xf32>, vector<8x16xf32> -> vector<8x32xf32>
    %188 = tpu.concatenate %95, %118 in 1 : vector<8x16xf32>, vector<8x16xf32> -> vector<8x32xf32>
    %189 = tpu.concatenate %117, %96 in 1 : vector<8x16xf32>, vector<8x16xf32> -> vector<8x32xf32>
    %190 = tpu.concatenate %139, %74 in 1 : vector<8x16xf32>, vector<8x16xf32> -> vector<8x32xf32>
    %191 = tpu.concatenate %161, %52 in 1 : vector<8x16xf32>, vector<8x16xf32> -> vector<8x32xf32>
    %192 = tpu.concatenate %183, %30 in 1 : vector<8x16xf32>, vector<8x16xf32> -> vector<8x32xf32>
    %193 = tpu.concatenate %185, %186, %187, %188, %189, %190, %191, %192 in 0 : vector<8x32xf32>, vector<8x32xf32>, vector<8x32xf32>, vector<8x32xf32>, vector<8x32xf32>, vector<8x32xf32>, vector<8x32xf32>, vector<8x32xf32> -> vector<64x32xf32>
    %194 = arith.truncf %193 : vector<64x32xf32> to vector<64x32xbf16>
    %c0_25 = arith.constant 0 : index
    %c0_26 = arith.constant 0 : index
    %195 = vector.load %arg5[%c0_25, %c0_26] : memref<32x5xbf16, #tpu.memory_space<vmem>>, vector<32x5xbf16>
    %cst_27 = arith.constant dense<0.000000e+00> : vector<64x5xf32>
    %196 = tpu.matmul %194, %195, %cst_27 {dimension_numbers = #tpu.dot_dimension_numbers<[1], [0], [0], [1], [0, 0, 1, 1], [], []>} : vector<64x32xbf16>, vector<32x5xbf16>, vector<64x5xf32> -> vector<64x5xf32>
    %c0_28 = arith.constant 0 : index
    %c0_29 = arith.constant 0 : index
    %197 = vector.load %arg6[%c0_28, %c0_29] : memref<1x5xf32, #tpu.memory_space<vmem>>, vector<1x5xf32>
    %198 = vector.broadcast %197 : vector<1x5xf32> to vector<64x5xf32>
    %199 = arith.addf %196, %198 : vector<64x5xf32>
    %c0_30 = arith.constant 0 : index
    %c0_31 = arith.constant 0 : index
    %200 = vector.load %arg8[%c0_30, %c0_31] : memref<64x5xf32, #tpu.memory_space<vmem>>, vector<64x5xf32>
    tpu.vector_store %arg8[%c0_30, %c0_31], %199 {strides = array<i32>} : memref<64x5xf32, #tpu.memory_space<vmem>>, vector<64x5xf32>,
    %c0_32 = arith.constant 0 : index
    %c0_33 = arith.constant 0 : index
    %201 = vector.load %arg7[%c0_32, %c0_33] : memref<5x5xf32, #tpu.memory_space<vmem>>, vector<5x5xf32>
    %202 = tpu.iota {dimensions = array<i32: 1>} : vector<8x5xi32>
    %203 = arith.sitofp %202 : vector<8x5xi32> to vector<8x5xf32>
    %c3_i32 = arith.constant 3 : i32
    %204 = vector.broadcast %c3_i32 : i32 to vector<8x5xi32>
    %205 = arith.cmpi eq, %202, %204 : vector<8x5xi32>
    %cst_34 = arith.constant 0.000000e+00 : f32
    %cst_35 = arith.constant -1.000000e+04 : f32
    %206 = vector.broadcast %cst_34 : f32 to vector<8x5xf32>
    %207 = vector.broadcast %cst_35 : f32 to vector<8x5xf32>
    %208 = arith.select %205, %206, %207 : vector<8x5xi1>, vector<8x5xf32>
    %209 = vector.extract_strided_slice %201 {offsets = [0, 0], sizes = [1, 5], strides = [1, 1]} : vector<5x5xf32> to vector<1x5xf32>
    %210 = vector.broadcast %209 : vector<1x5xf32> to vector<8x5xf32>
    %211 = arith.addf %208, %210 : vector<8x5xf32>
    %cst_36 = arith.constant dense<0xFF800000> : vector<8xf32>
    %212 = vector.multi_reduction <maximumf>, %211, %cst_36 [1] : vector<8x5xf32> to vector<8xf32>
    %213 = vector.shape_cast %212 : vector<8xf32> to vector<8x1xf32>
    %214 = vector.broadcast %213 : vector<8x1xf32> to vector<8x5xf32>
    %215 = arith.cmpf oeq, %211, %214 : vector<8x5xf32>
    %cst_37 = arith.constant 5.000000e+00 : f32
    %216 = vector.broadcast %cst_37 : f32 to vector<8x5xf32>
    %217 = arith.select %215, %203, %216 : vector<8x5xi1>, vector<8x5xf32>
    %cst_38 = arith.constant dense<0x7F800000> : vector<8xf32>
    %218 = vector.multi_reduction <minimumf>, %217, %cst_38 [1] : vector<8x5xf32> to vector<8xf32>
    %219 = vector.shape_cast %218 : vector<8xf32> to vector<8x1xf32>
    %220 = vector.extract_strided_slice %201 {offsets = [1, 0], sizes = [1, 5], strides = [1, 1]} : vector<5x5xf32> to vector<1x5xf32>
    %221 = vector.broadcast %220 : vector<1x5xf32> to vector<8x5xf32>
    %222 = arith.addf %208, %221 : vector<8x5xf32>
    %cst_39 = arith.constant dense<0xFF800000> : vector<8xf32>
    %223 = vector.multi_reduction <maximumf>, %222, %cst_39 [1] : vector<8x5xf32> to vector<8xf32>
    %224 = vector.shape_cast %223 : vector<8xf32> to vector<8x1xf32>
    %225 = vector.broadcast %224 : vector<8x1xf32> to vector<8x5xf32>
    %226 = arith.cmpf oeq, %222, %225 : vector<8x5xf32>
    %cst_40 = arith.constant 5.000000e+00 : f32
    %227 = vector.broadcast %cst_40 : f32 to vector<8x5xf32>
    %228 = arith.select %226, %203, %227 : vector<8x5xi1>, vector<8x5xf32>
    %cst_41 = arith.constant dense<0x7F800000> : vector<8xf32>
    %229 = vector.multi_reduction <minimumf>, %228, %cst_41 [1] : vector<8x5xf32> to vector<8xf32>
    %230 = vector.shape_cast %229 : vector<8xf32> to vector<8x1xf32>
    %231 = vector.extract_strided_slice %201 {offsets = [2, 0], sizes = [1, 5], strides = [1, 1]} : vector<5x5xf32> to vector<1x5xf32>
    %232 = vector.broadcast %231 : vector<1x5xf32> to vector<8x5xf32>
    %233 = arith.addf %208, %232 : vector<8x5xf32>
    %cst_42 = arith.constant dense<0xFF800000> : vector<8xf32>
    %234 = vector.multi_reduction <maximumf>, %233, %cst_42 [1] : vector<8x5xf32> to vector<8xf32>
    %235 = vector.shape_cast %234 : vector<8xf32> to vector<8x1xf32>
    %236 = vector.broadcast %235 : vector<8x1xf32> to vector<8x5xf32>
    %237 = arith.cmpf oeq, %233, %236 : vector<8x5xf32>
    %cst_43 = arith.constant 5.000000e+00 : f32
    %238 = vector.broadcast %cst_43 : f32 to vector<8x5xf32>
    %239 = arith.select %237, %203, %238 : vector<8x5xi1>, vector<8x5xf32>
    %cst_44 = arith.constant dense<0x7F800000> : vector<8xf32>
    %240 = vector.multi_reduction <minimumf>, %239, %cst_44 [1] : vector<8x5xf32> to vector<8xf32>
    %241 = vector.shape_cast %240 : vector<8xf32> to vector<8x1xf32>
    %242 = vector.extract_strided_slice %201 {offsets = [3, 0], sizes = [1, 5], strides = [1, 1]} : vector<5x5xf32> to vector<1x5xf32>
    %243 = vector.broadcast %242 : vector<1x5xf32> to vector<8x5xf32>
    %244 = arith.addf %208, %243 : vector<8x5xf32>
    %cst_45 = arith.constant dense<0xFF800000> : vector<8xf32>
    %245 = vector.multi_reduction <maximumf>, %244, %cst_45 [1] : vector<8x5xf32> to vector<8xf32>
    %246 = vector.shape_cast %245 : vector<8xf32> to vector<8x1xf32>
    %247 = vector.broadcast %246 : vector<8x1xf32> to vector<8x5xf32>
    %248 = arith.cmpf oeq, %244, %247 : vector<8x5xf32>
    %cst_46 = arith.constant 5.000000e+00 : f32
    %249 = vector.broadcast %cst_46 : f32 to vector<8x5xf32>
    %250 = arith.select %248, %203, %249 : vector<8x5xi1>, vector<8x5xf32>
    %cst_47 = arith.constant dense<0x7F800000> : vector<8xf32>
    %251 = vector.multi_reduction <minimumf>, %250, %cst_47 [1] : vector<8x5xf32> to vector<8xf32>
    %252 = vector.shape_cast %251 : vector<8xf32> to vector<8x1xf32>
    %253 = vector.extract_strided_slice %201 {offsets = [4, 0], sizes = [1, 5], strides = [1, 1]} : vector<5x5xf32> to vector<1x5xf32>
    %254 = vector.broadcast %253 : vector<1x5xf32> to vector<8x5xf32>
    %255 = arith.addf %208, %254 : vector<8x5xf32>
    %cst_48 = arith.constant dense<0xFF800000> : vector<8xf32>
    %256 = vector.multi_reduction <maximumf>, %255, %cst_48 [1] : vector<8x5xf32> to vector<8xf32>
    %257 = vector.shape_cast %256 : vector<8xf32> to vector<8x1xf32>
    %258 = vector.broadcast %257 : vector<8x1xf32> to vector<8x5xf32>
    %259 = arith.cmpf oeq, %255, %258 : vector<8x5xf32>
    %cst_49 = arith.constant 5.000000e+00 : f32
    %260 = vector.broadcast %cst_49 : f32 to vector<8x5xf32>
    %261 = arith.select %259, %203, %260 : vector<8x5xi1>, vector<8x5xf32>
    %cst_50 = arith.constant dense<0x7F800000> : vector<8xf32>
    %262 = vector.multi_reduction <minimumf>, %261, %cst_50 [1] : vector<8x5xf32> to vector<8xf32>
    %263 = vector.shape_cast %262 : vector<8xf32> to vector<8x1xf32>
    %264 = tpu.concatenate %219, %230, %241, %252, %263 in 1 : vector<8x1xf32>, vector<8x1xf32>, vector<8x1xf32>, vector<8x1xf32>, vector<8x1xf32> -> vector<8x5xf32>
    %265 = tpu.concatenate %213, %224, %235, %246, %257 in 1 : vector<8x1xf32>, vector<8x1xf32>, vector<8x1xf32>, vector<8x1xf32>, vector<8x1xf32> -> vector<8x5xf32>
    %266 = vector.extract_strided_slice %199 {offsets = [0, 0], sizes = [8, 5], strides = [1, 1]} : vector<64x5xf32> to vector<8x5xf32>
    %267 = arith.addf %265, %266 : vector<8x5xf32>
    %268 = vector.extract_strided_slice %201 {offsets = [0, 0], sizes = [1, 5], strides = [1, 1]} : vector<5x5xf32> to vector<1x5xf32>
    %269 = vector.broadcast %268 : vector<1x5xf32> to vector<8x5xf32>
    %270 = arith.addf %267, %269 : vector<8x5xf32>
    %cst_51 = arith.constant dense<0xFF800000> : vector<8xf32>
    %271 = vector.multi_reduction <maximumf>, %270, %cst_51 [1] : vector<8x5xf32> to vector<8xf32>
    %272 = vector.shape_cast %271 : vector<8xf32> to vector<8x1xf32>
    %273 = vector.broadcast %272 : vector<8x1xf32> to vector<8x5xf32>
    %274 = arith.cmpf oeq, %270, %273 : vector<8x5xf32>
    %cst_52 = arith.constant 5.000000e+00 : f32
    %275 = vector.broadcast %cst_52 : f32 to vector<8x5xf32>
    %276 = arith.select %274, %203, %275 : vector<8x5xi1>, vector<8x5xf32>
    %cst_53 = arith.constant dense<0x7F800000> : vector<8xf32>
    %277 = vector.multi_reduction <minimumf>, %276, %cst_53 [1] : vector<8x5xf32> to vector<8xf32>
    %278 = vector.shape_cast %277 : vector<8xf32> to vector<8x1xf32>
    %279 = vector.extract_strided_slice %201 {offsets = [1, 0], sizes = [1, 5], strides = [1, 1]} : vector<5x5xf32> to vector<1x5xf32>
    %280 = vector.broadcast %279 : vector<1x5xf32> to vector<8x5xf32>
    %281 = arith.addf %267, %280 : vector<8x5xf32>
    %cst_54 = arith.constant dense<0xFF800000> : vector<8xf32>
    %282 = vector.multi_reduction <maximumf>, %281, %cst_54 [1] : vector<8x5xf32> to vector<8xf32>
    %283 = vector.shape_cast %282 : vector<8xf32> to vector<8x1xf32>
    %284 = vector.broadcast %283 : vector<8x1xf32> to vector<8x5xf32>
    %285 = arith.cmpf oeq, %281, %284 : vector<8x5xf32>
    %cst_55 = arith.constant 5.000000e+00 : f32
    %286 = vector.broadcast %cst_55 : f32 to vector<8x5xf32>
    %287 = arith.select %285, %203, %286 : vector<8x5xi1>, vector<8x5xf32>
    %cst_56 = arith.constant dense<0x7F800000> : vector<8xf32>
    %288 = vector.multi_reduction <minimumf>, %287, %cst_56 [1] : vector<8x5xf32> to vector<8xf32>
    %289 = vector.shape_cast %288 : vector<8xf32> to vector<8x1xf32>
    %290 = vector.extract_strided_slice %201 {offsets = [2, 0], sizes = [1, 5], strides = [1, 1]} : vector<5x5xf32> to vector<1x5xf32>
    %291 = vector.broadcast %290 : vector<1x5xf32> to vector<8x5xf32>
    %292 = arith.addf %267, %291 : vector<8x5xf32>
    %cst_57 = arith.constant dense<0xFF800000> : vector<8xf32>
    %293 = vector.multi_reduction <maximumf>, %292, %cst_57 [1] : vector<8x5xf32> to vector<8xf32>
    %294 = vector.shape_cast %293 : vector<8xf32> to vector<8x1xf32>
    %295 = vector.broadcast %294 : vector<8x1xf32> to vector<8x5xf32>
    %296 = arith.cmpf oeq, %292, %295 : vector<8x5xf32>
    %cst_58 = arith.constant 5.000000e+00 : f32
    %297 = vector.broadcast %cst_58 : f32 to vector<8x5xf32>
    %298 = arith.select %296, %203, %297 : vector<8x5xi1>, vector<8x5xf32>
    %cst_59 = arith.constant dense<0x7F800000> : vector<8xf32>
    %299 = vector.multi_reduction <minimumf>, %298, %cst_59 [1] : vector<8x5xf32> to vector<8xf32>
    %300 = vector.shape_cast %299 : vector<8xf32> to vector<8x1xf32>
    %301 = vector.extract_strided_slice %201 {offsets = [3, 0], sizes = [1, 5], strides = [1, 1]} : vector<5x5xf32> to vector<1x5xf32>
    %302 = vector.broadcast %301 : vector<1x5xf32> to vector<8x5xf32>
    %303 = arith.addf %267, %302 : vector<8x5xf32>
    %cst_60 = arith.constant dense<0xFF800000> : vector<8xf32>
    %304 = vector.multi_reduction <maximumf>, %303, %cst_60 [1] : vector<8x5xf32> to vector<8xf32>
    %305 = vector.shape_cast %304 : vector<8xf32> to vector<8x1xf32>
    %306 = vector.broadcast %305 : vector<8x1xf32> to vector<8x5xf32>
    %307 = arith.cmpf oeq, %303, %306 : vector<8x5xf32>
    %cst_61 = arith.constant 5.000000e+00 : f32
    %308 = vector.broadcast %cst_61 : f32 to vector<8x5xf32>
    %309 = arith.select %307, %203, %308 : vector<8x5xi1>, vector<8x5xf32>
    %cst_62 = arith.constant dense<0x7F800000> : vector<8xf32>
    %310 = vector.multi_reduction <minimumf>, %309, %cst_62 [1] : vector<8x5xf32> to vector<8xf32>
    %311 = vector.shape_cast %310 : vector<8xf32> to vector<8x1xf32>
    %312 = vector.extract_strided_slice %201 {offsets = [4, 0], sizes = [1, 5], strides = [1, 1]} : vector<5x5xf32> to vector<1x5xf32>
    %313 = vector.broadcast %312 : vector<1x5xf32> to vector<8x5xf32>
    %314 = arith.addf %267, %313 : vector<8x5xf32>
    %cst_63 = arith.constant dense<0xFF800000> : vector<8xf32>
    %315 = vector.multi_reduction <maximumf>, %314, %cst_63 [1] : vector<8x5xf32> to vector<8xf32>
    %316 = vector.shape_cast %315 : vector<8xf32> to vector<8x1xf32>
    %317 = vector.broadcast %316 : vector<8x1xf32> to vector<8x5xf32>
    %318 = arith.cmpf oeq, %314, %317 : vector<8x5xf32>
    %cst_64 = arith.constant 5.000000e+00 : f32
    %319 = vector.broadcast %cst_64 : f32 to vector<8x5xf32>
    %320 = arith.select %318, %203, %319 : vector<8x5xi1>, vector<8x5xf32>
    %cst_65 = arith.constant dense<0x7F800000> : vector<8xf32>
    %321 = vector.multi_reduction <minimumf>, %320, %cst_65 [1] : vector<8x5xf32> to vector<8xf32>
    %322 = vector.shape_cast %321 : vector<8xf32> to vector<8x1xf32>
    %323 = tpu.concatenate %278, %289, %300, %311, %322 in 1 : vector<8x1xf32>, vector<8x1xf32>, vector<8x1xf32>, vector<8x1xf32>, vector<8x1xf32> -> vector<8x5xf32>
    %324 = tpu.concatenate %272, %283, %294, %305, %316 in 1 : vector<8x1xf32>, vector<8x1xf32>, vector<8x1xf32>, vector<8x1xf32>, vector<8x1xf32> -> vector<8x5xf32>
    %325 = vector.extract_strided_slice %199 {offsets = [8, 0], sizes = [8, 5], strides = [1, 1]} : vector<64x5xf32> to vector<8x5xf32>
    %326 = arith.addf %324, %325 : vector<8x5xf32>
    %327 = vector.extract_strided_slice %201 {offsets = [0, 0], sizes = [1, 5], strides = [1, 1]} : vector<5x5xf32> to vector<1x5xf32>
    %328 = vector.broadcast %327 : vector<1x5xf32> to vector<8x5xf32>
    %329 = arith.addf %326, %328 : vector<8x5xf32>
    %cst_66 = arith.constant dense<0xFF800000> : vector<8xf32>
    %330 = vector.multi_reduction <maximumf>, %329, %cst_66 [1] : vector<8x5xf32> to vector<8xf32>
    %331 = vector.shape_cast %330 : vector<8xf32> to vector<8x1xf32>
    %332 = vector.broadcast %331 : vector<8x1xf32> to vector<8x5xf32>
    %333 = arith.cmpf oeq, %329, %332 : vector<8x5xf32>
    %cst_67 = arith.constant 5.000000e+00 : f32
    %334 = vector.broadcast %cst_67 : f32 to vector<8x5xf32>
    %335 = arith.select %333, %203, %334 : vector<8x5xi1>, vector<8x5xf32>
    %cst_68 = arith.constant dense<0x7F800000> : vector<8xf32>
    %336 = vector.multi_reduction <minimumf>, %335, %cst_68 [1] : vector<8x5xf32> to vector<8xf32>
    %337 = vector.shape_cast %336 : vector<8xf32> to vector<8x1xf32>
    %338 = vector.extract_strided_slice %201 {offsets = [1, 0], sizes = [1, 5], strides = [1, 1]} : vector<5x5xf32> to vector<1x5xf32>
    %339 = vector.broadcast %338 : vector<1x5xf32> to vector<8x5xf32>
    %340 = arith.addf %326, %339 : vector<8x5xf32>
    %cst_69 = arith.constant dense<0xFF800000> : vector<8xf32>
    %341 = vector.multi_reduction <maximumf>, %340, %cst_69 [1] : vector<8x5xf32> to vector<8xf32>
    %342 = vector.shape_cast %341 : vector<8xf32> to vector<8x1xf32>
    %343 = vector.broadcast %342 : vector<8x1xf32> to vector<8x5xf32>
    %344 = arith.cmpf oeq, %340, %343 : vector<8x5xf32>
    %cst_70 = arith.constant 5.000000e+00 : f32
    %345 = vector.broadcast %cst_70 : f32 to vector<8x5xf32>
    %346 = arith.select %344, %203, %345 : vector<8x5xi1>, vector<8x5xf32>
    %cst_71 = arith.constant dense<0x7F800000> : vector<8xf32>
    %347 = vector.multi_reduction <minimumf>, %346, %cst_71 [1] : vector<8x5xf32> to vector<8xf32>
    %348 = vector.shape_cast %347 : vector<8xf32> to vector<8x1xf32>
    %349 = vector.extract_strided_slice %201 {offsets = [2, 0], sizes = [1, 5], strides = [1, 1]} : vector<5x5xf32> to vector<1x5xf32>
    %350 = vector.broadcast %349 : vector<1x5xf32> to vector<8x5xf32>
    %351 = arith.addf %326, %350 : vector<8x5xf32>
    %cst_72 = arith.constant dense<0xFF800000> : vector<8xf32>
    %352 = vector.multi_reduction <maximumf>, %351, %cst_72 [1] : vector<8x5xf32> to vector<8xf32>
    %353 = vector.shape_cast %352 : vector<8xf32> to vector<8x1xf32>
    %354 = vector.broadcast %353 : vector<8x1xf32> to vector<8x5xf32>
    %355 = arith.cmpf oeq, %351, %354 : vector<8x5xf32>
    %cst_73 = arith.constant 5.000000e+00 : f32
    %356 = vector.broadcast %cst_73 : f32 to vector<8x5xf32>
    %357 = arith.select %355, %203, %356 : vector<8x5xi1>, vector<8x5xf32>
    %cst_74 = arith.constant dense<0x7F800000> : vector<8xf32>
    %358 = vector.multi_reduction <minimumf>, %357, %cst_74 [1] : vector<8x5xf32> to vector<8xf32>
    %359 = vector.shape_cast %358 : vector<8xf32> to vector<8x1xf32>
    %360 = vector.extract_strided_slice %201 {offsets = [3, 0], sizes = [1, 5], strides = [1, 1]} : vector<5x5xf32> to vector<1x5xf32>
    %361 = vector.broadcast %360 : vector<1x5xf32> to vector<8x5xf32>
    %362 = arith.addf %326, %361 : vector<8x5xf32>
    %cst_75 = arith.constant dense<0xFF800000> : vector<8xf32>
    %363 = vector.multi_reduction <maximumf>, %362, %cst_75 [1] : vector<8x5xf32> to vector<8xf32>
    %364 = vector.shape_cast %363 : vector<8xf32> to vector<8x1xf32>
    %365 = vector.broadcast %364 : vector<8x1xf32> to vector<8x5xf32>
    %366 = arith.cmpf oeq, %362, %365 : vector<8x5xf32>
    %cst_76 = arith.constant 5.000000e+00 : f32
    %367 = vector.broadcast %cst_76 : f32 to vector<8x5xf32>
    %368 = arith.select %366, %203, %367 : vector<8x5xi1>, vector<8x5xf32>
    %cst_77 = arith.constant dense<0x7F800000> : vector<8xf32>
    %369 = vector.multi_reduction <minimumf>, %368, %cst_77 [1] : vector<8x5xf32> to vector<8xf32>
    %370 = vector.shape_cast %369 : vector<8xf32> to vector<8x1xf32>
    %371 = vector.extract_strided_slice %201 {offsets = [4, 0], sizes = [1, 5], strides = [1, 1]} : vector<5x5xf32> to vector<1x5xf32>
    %372 = vector.broadcast %371 : vector<1x5xf32> to vector<8x5xf32>
    %373 = arith.addf %326, %372 : vector<8x5xf32>
    %cst_78 = arith.constant dense<0xFF800000> : vector<8xf32>
    %374 = vector.multi_reduction <maximumf>, %373, %cst_78 [1] : vector<8x5xf32> to vector<8xf32>
    %375 = vector.shape_cast %374 : vector<8xf32> to vector<8x1xf32>
    %376 = vector.broadcast %375 : vector<8x1xf32> to vector<8x5xf32>
    %377 = arith.cmpf oeq, %373, %376 : vector<8x5xf32>
    %cst_79 = arith.constant 5.000000e+00 : f32
    %378 = vector.broadcast %cst_79 : f32 to vector<8x5xf32>
    %379 = arith.select %377, %203, %378 : vector<8x5xi1>, vector<8x5xf32>
    %cst_80 = arith.constant dense<0x7F800000> : vector<8xf32>
    %380 = vector.multi_reduction <minimumf>, %379, %cst_80 [1] : vector<8x5xf32> to vector<8xf32>
    %381 = vector.shape_cast %380 : vector<8xf32> to vector<8x1xf32>
    %382 = tpu.concatenate %337, %348, %359, %370, %381 in 1 : vector<8x1xf32>, vector<8x1xf32>, vector<8x1xf32>, vector<8x1xf32>, vector<8x1xf32> -> vector<8x5xf32>
    %383 = tpu.concatenate %331, %342, %353, %364, %375 in 1 : vector<8x1xf32>, vector<8x1xf32>, vector<8x1xf32>, vector<8x1xf32>, vector<8x1xf32> -> vector<8x5xf32>
    %384 = vector.extract_strided_slice %199 {offsets = [16, 0], sizes = [8, 5], strides = [1, 1]} : vector<64x5xf32> to vector<8x5xf32>
    %385 = arith.addf %383, %384 : vector<8x5xf32>
    %386 = vector.extract_strided_slice %201 {offsets = [0, 0], sizes = [1, 5], strides = [1, 1]} : vector<5x5xf32> to vector<1x5xf32>
    %387 = vector.broadcast %386 : vector<1x5xf32> to vector<8x5xf32>
    %388 = arith.addf %385, %387 : vector<8x5xf32>
    %cst_81 = arith.constant dense<0xFF800000> : vector<8xf32>
    %389 = vector.multi_reduction <maximumf>, %388, %cst_81 [1] : vector<8x5xf32> to vector<8xf32>
    %390 = vector.shape_cast %389 : vector<8xf32> to vector<8x1xf32>
    %391 = vector.broadcast %390 : vector<8x1xf32> to vector<8x5xf32>
    %392 = arith.cmpf oeq, %388, %391 : vector<8x5xf32>
    %cst_82 = arith.constant 5.000000e+00 : f32
    %393 = vector.broadcast %cst_82 : f32 to vector<8x5xf32>
    %394 = arith.select %392, %203, %393 : vector<8x5xi1>, vector<8x5xf32>
    %cst_83 = arith.constant dense<0x7F800000> : vector<8xf32>
    %395 = vector.multi_reduction <minimumf>, %394, %cst_83 [1] : vector<8x5xf32> to vector<8xf32>
    %396 = vector.shape_cast %395 : vector<8xf32> to vector<8x1xf32>
    %397 = vector.extract_strided_slice %201 {offsets = [1, 0], sizes = [1, 5], strides = [1, 1]} : vector<5x5xf32> to vector<1x5xf32>
    %398 = vector.broadcast %397 : vector<1x5xf32> to vector<8x5xf32>
    %399 = arith.addf %385, %398 : vector<8x5xf32>
    %cst_84 = arith.constant dense<0xFF800000> : vector<8xf32>
    %400 = vector.multi_reduction <maximumf>, %399, %cst_84 [1] : vector<8x5xf32> to vector<8xf32>
    %401 = vector.shape_cast %400 : vector<8xf32> to vector<8x1xf32>
    %402 = vector.broadcast %401 : vector<8x1xf32> to vector<8x5xf32>
    %403 = arith.cmpf oeq, %399, %402 : vector<8x5xf32>
    %cst_85 = arith.constant 5.000000e+00 : f32
    %404 = vector.broadcast %cst_85 : f32 to vector<8x5xf32>
    %405 = arith.select %403, %203, %404 : vector<8x5xi1>, vector<8x5xf32>
    %cst_86 = arith.constant dense<0x7F800000> : vector<8xf32>
    %406 = vector.multi_reduction <minimumf>, %405, %cst_86 [1] : vector<8x5xf32> to vector<8xf32>
    %407 = vector.shape_cast %406 : vector<8xf32> to vector<8x1xf32>
    %408 = vector.extract_strided_slice %201 {offsets = [2, 0], sizes = [1, 5], strides = [1, 1]} : vector<5x5xf32> to vector<1x5xf32>
    %409 = vector.broadcast %408 : vector<1x5xf32> to vector<8x5xf32>
    %410 = arith.addf %385, %409 : vector<8x5xf32>
    %cst_87 = arith.constant dense<0xFF800000> : vector<8xf32>
    %411 = vector.multi_reduction <maximumf>, %410, %cst_87 [1] : vector<8x5xf32> to vector<8xf32>
    %412 = vector.shape_cast %411 : vector<8xf32> to vector<8x1xf32>
    %413 = vector.broadcast %412 : vector<8x1xf32> to vector<8x5xf32>
    %414 = arith.cmpf oeq, %410, %413 : vector<8x5xf32>
    %cst_88 = arith.constant 5.000000e+00 : f32
    %415 = vector.broadcast %cst_88 : f32 to vector<8x5xf32>
    %416 = arith.select %414, %203, %415 : vector<8x5xi1>, vector<8x5xf32>
    %cst_89 = arith.constant dense<0x7F800000> : vector<8xf32>
    %417 = vector.multi_reduction <minimumf>, %416, %cst_89 [1] : vector<8x5xf32> to vector<8xf32>
    %418 = vector.shape_cast %417 : vector<8xf32> to vector<8x1xf32>
    %419 = vector.extract_strided_slice %201 {offsets = [3, 0], sizes = [1, 5], strides = [1, 1]} : vector<5x5xf32> to vector<1x5xf32>
    %420 = vector.broadcast %419 : vector<1x5xf32> to vector<8x5xf32>
    %421 = arith.addf %385, %420 : vector<8x5xf32>
    %cst_90 = arith.constant dense<0xFF800000> : vector<8xf32>
    %422 = vector.multi_reduction <maximumf>, %421, %cst_90 [1] : vector<8x5xf32> to vector<8xf32>
    %423 = vector.shape_cast %422 : vector<8xf32> to vector<8x1xf32>
    %424 = vector.broadcast %423 : vector<8x1xf32> to vector<8x5xf32>
    %425 = arith.cmpf oeq, %421, %424 : vector<8x5xf32>
    %cst_91 = arith.constant 5.000000e+00 : f32
    %426 = vector.broadcast %cst_91 : f32 to vector<8x5xf32>
    %427 = arith.select %425, %203, %426 : vector<8x5xi1>, vector<8x5xf32>
    %cst_92 = arith.constant dense<0x7F800000> : vector<8xf32>
    %428 = vector.multi_reduction <minimumf>, %427, %cst_92 [1] : vector<8x5xf32> to vector<8xf32>
    %429 = vector.shape_cast %428 : vector<8xf32> to vector<8x1xf32>
    %430 = vector.extract_strided_slice %201 {offsets = [4, 0], sizes = [1, 5], strides = [1, 1]} : vector<5x5xf32> to vector<1x5xf32>
    %431 = vector.broadcast %430 : vector<1x5xf32> to vector<8x5xf32>
    %432 = arith.addf %385, %431 : vector<8x5xf32>
    %cst_93 = arith.constant dense<0xFF800000> : vector<8xf32>
    %433 = vector.multi_reduction <maximumf>, %432, %cst_93 [1] : vector<8x5xf32> to vector<8xf32>
    %434 = vector.shape_cast %433 : vector<8xf32> to vector<8x1xf32>
    %435 = vector.broadcast %434 : vector<8x1xf32> to vector<8x5xf32>
    %436 = arith.cmpf oeq, %432, %435 : vector<8x5xf32>
    %cst_94 = arith.constant 5.000000e+00 : f32
    %437 = vector.broadcast %cst_94 : f32 to vector<8x5xf32>
    %438 = arith.select %436, %203, %437 : vector<8x5xi1>, vector<8x5xf32>
    %cst_95 = arith.constant dense<0x7F800000> : vector<8xf32>
    %439 = vector.multi_reduction <minimumf>, %438, %cst_95 [1] : vector<8x5xf32> to vector<8xf32>
    %440 = vector.shape_cast %439 : vector<8xf32> to vector<8x1xf32>
    %441 = tpu.concatenate %396, %407, %418, %429, %440 in 1 : vector<8x1xf32>, vector<8x1xf32>, vector<8x1xf32>, vector<8x1xf32>, vector<8x1xf32> -> vector<8x5xf32>
    %442 = tpu.concatenate %390, %401, %412, %423, %434 in 1 : vector<8x1xf32>, vector<8x1xf32>, vector<8x1xf32>, vector<8x1xf32>, vector<8x1xf32> -> vector<8x5xf32>
    %443 = vector.extract_strided_slice %199 {offsets = [24, 0], sizes = [8, 5], strides = [1, 1]} : vector<64x5xf32> to vector<8x5xf32>
    %444 = arith.addf %442, %443 : vector<8x5xf32>
    %445 = vector.extract_strided_slice %201 {offsets = [0, 0], sizes = [1, 5], strides = [1, 1]} : vector<5x5xf32> to vector<1x5xf32>
    %446 = vector.broadcast %445 : vector<1x5xf32> to vector<8x5xf32>
    %447 = arith.addf %444, %446 : vector<8x5xf32>
    %cst_96 = arith.constant dense<0xFF800000> : vector<8xf32>
    %448 = vector.multi_reduction <maximumf>, %447, %cst_96 [1] : vector<8x5xf32> to vector<8xf32>
    %449 = vector.shape_cast %448 : vector<8xf32> to vector<8x1xf32>
    %450 = vector.broadcast %449 : vector<8x1xf32> to vector<8x5xf32>
    %451 = arith.cmpf oeq, %447, %450 : vector<8x5xf32>
    %cst_97 = arith.constant 5.000000e+00 : f32
    %452 = vector.broadcast %cst_97 : f32 to vector<8x5xf32>
    %453 = arith.select %451, %203, %452 : vector<8x5xi1>, vector<8x5xf32>
    %cst_98 = arith.constant dense<0x7F800000> : vector<8xf32>
    %454 = vector.multi_reduction <minimumf>, %453, %cst_98 [1] : vector<8x5xf32> to vector<8xf32>
    %455 = vector.shape_cast %454 : vector<8xf32> to vector<8x1xf32>
    %456 = vector.extract_strided_slice %201 {offsets = [1, 0], sizes = [1, 5], strides = [1, 1]} : vector<5x5xf32> to vector<1x5xf32>
    %457 = vector.broadcast %456 : vector<1x5xf32> to vector<8x5xf32>
    %458 = arith.addf %444, %457 : vector<8x5xf32>
    %cst_99 = arith.constant dense<0xFF800000> : vector<8xf32>
    %459 = vector.multi_reduction <maximumf>, %458, %cst_99 [1] : vector<8x5xf32> to vector<8xf32>
    %460 = vector.shape_cast %459 : vector<8xf32> to vector<8x1xf32>
    %461 = vector.broadcast %460 : vector<8x1xf32> to vector<8x5xf32>
    %462 = arith.cmpf oeq, %458, %461 : vector<8x5xf32>
    %cst_100 = arith.constant 5.000000e+00 : f32
    %463 = vector.broadcast %cst_100 : f32 to vector<8x5xf32>
    %464 = arith.select %462, %203, %463 : vector<8x5xi1>, vector<8x5xf32>
    %cst_101 = arith.constant dense<0x7F800000> : vector<8xf32>
    %465 = vector.multi_reduction <minimumf>, %464, %cst_101 [1] : vector<8x5xf32> to vector<8xf32>
    %466 = vector.shape_cast %465 : vector<8xf32> to vector<8x1xf32>
    %467 = vector.extract_strided_slice %201 {offsets = [2, 0], sizes = [1, 5], strides = [1, 1]} : vector<5x5xf32> to vector<1x5xf32>
    %468 = vector.broadcast %467 : vector<1x5xf32> to vector<8x5xf32>
    %469 = arith.addf %444, %468 : vector<8x5xf32>
    %cst_102 = arith.constant dense<0xFF800000> : vector<8xf32>
    %470 = vector.multi_reduction <maximumf>, %469, %cst_102 [1] : vector<8x5xf32> to vector<8xf32>
    %471 = vector.shape_cast %470 : vector<8xf32> to vector<8x1xf32>
    %472 = vector.broadcast %471 : vector<8x1xf32> to vector<8x5xf32>
    %473 = arith.cmpf oeq, %469, %472 : vector<8x5xf32>
    %cst_103 = arith.constant 5.000000e+00 : f32
    %474 = vector.broadcast %cst_103 : f32 to vector<8x5xf32>
    %475 = arith.select %473, %203, %474 : vector<8x5xi1>, vector<8x5xf32>
    %cst_104 = arith.constant dense<0x7F800000> : vector<8xf32>
    %476 = vector.multi_reduction <minimumf>, %475, %cst_104 [1] : vector<8x5xf32> to vector<8xf32>
    %477 = vector.shape_cast %476 : vector<8xf32> to vector<8x1xf32>
    %478 = vector.extract_strided_slice %201 {offsets = [3, 0], sizes = [1, 5], strides = [1, 1]} : vector<5x5xf32> to vector<1x5xf32>
    %479 = vector.broadcast %478 : vector<1x5xf32> to vector<8x5xf32>
    %480 = arith.addf %444, %479 : vector<8x5xf32>
    %cst_105 = arith.constant dense<0xFF800000> : vector<8xf32>
    %481 = vector.multi_reduction <maximumf>, %480, %cst_105 [1] : vector<8x5xf32> to vector<8xf32>
    %482 = vector.shape_cast %481 : vector<8xf32> to vector<8x1xf32>
    %483 = vector.broadcast %482 : vector<8x1xf32> to vector<8x5xf32>
    %484 = arith.cmpf oeq, %480, %483 : vector<8x5xf32>
    %cst_106 = arith.constant 5.000000e+00 : f32
    %485 = vector.broadcast %cst_106 : f32 to vector<8x5xf32>
    %486 = arith.select %484, %203, %485 : vector<8x5xi1>, vector<8x5xf32>
    %cst_107 = arith.constant dense<0x7F800000> : vector<8xf32>
    %487 = vector.multi_reduction <minimumf>, %486, %cst_107 [1] : vector<8x5xf32> to vector<8xf32>
    %488 = vector.shape_cast %487 : vector<8xf32> to vector<8x1xf32>
    %489 = vector.extract_strided_slice %201 {offsets = [4, 0], sizes = [1, 5], strides = [1, 1]} : vector<5x5xf32> to vector<1x5xf32>
    %490 = vector.broadcast %489 : vector<1x5xf32> to vector<8x5xf32>
    %491 = arith.addf %444, %490 : vector<8x5xf32>
    %cst_108 = arith.constant dense<0xFF800000> : vector<8xf32>
    %492 = vector.multi_reduction <maximumf>, %491, %cst_108 [1] : vector<8x5xf32> to vector<8xf32>
    %493 = vector.shape_cast %492 : vector<8xf32> to vector<8x1xf32>
    %494 = vector.broadcast %493 : vector<8x1xf32> to vector<8x5xf32>
    %495 = arith.cmpf oeq, %491, %494 : vector<8x5xf32>
    %cst_109 = arith.constant 5.000000e+00 : f32
    %496 = vector.broadcast %cst_109 : f32 to vector<8x5xf32>
    %497 = arith.select %495, %203, %496 : vector<8x5xi1>, vector<8x5xf32>
    %cst_110 = arith.constant dense<0x7F800000> : vector<8xf32>
    %498 = vector.multi_reduction <minimumf>, %497, %cst_110 [1] : vector<8x5xf32> to vector<8xf32>
    %499 = vector.shape_cast %498 : vector<8xf32> to vector<8x1xf32>
    %500 = tpu.concatenate %455, %466, %477, %488, %499 in 1 : vector<8x1xf32>, vector<8x1xf32>, vector<8x1xf32>, vector<8x1xf32>, vector<8x1xf32> -> vector<8x5xf32>
    %501 = tpu.concatenate %449, %460, %471, %482, %493 in 1 : vector<8x1xf32>, vector<8x1xf32>, vector<8x1xf32>, vector<8x1xf32>, vector<8x1xf32> -> vector<8x5xf32>
    %502 = vector.extract_strided_slice %199 {offsets = [32, 0], sizes = [8, 5], strides = [1, 1]} : vector<64x5xf32> to vector<8x5xf32>
    %503 = arith.addf %501, %502 : vector<8x5xf32>
    %504 = vector.extract_strided_slice %201 {offsets = [0, 0], sizes = [1, 5], strides = [1, 1]} : vector<5x5xf32> to vector<1x5xf32>
    %505 = vector.broadcast %504 : vector<1x5xf32> to vector<8x5xf32>
    %506 = arith.addf %503, %505 : vector<8x5xf32>
    %cst_111 = arith.constant dense<0xFF800000> : vector<8xf32>
    %507 = vector.multi_reduction <maximumf>, %506, %cst_111 [1] : vector<8x5xf32> to vector<8xf32>
    %508 = vector.shape_cast %507 : vector<8xf32> to vector<8x1xf32>
    %509 = vector.broadcast %508 : vector<8x1xf32> to vector<8x5xf32>
    %510 = arith.cmpf oeq, %506, %509 : vector<8x5xf32>
    %cst_112 = arith.constant 5.000000e+00 : f32
    %511 = vector.broadcast %cst_112 : f32 to vector<8x5xf32>
    %512 = arith.select %510, %203, %511 : vector<8x5xi1>, vector<8x5xf32>
    %cst_113 = arith.constant dense<0x7F800000> : vector<8xf32>
    %513 = vector.multi_reduction <minimumf>, %512, %cst_113 [1] : vector<8x5xf32> to vector<8xf32>
    %514 = vector.shape_cast %513 : vector<8xf32> to vector<8x1xf32>
    %515 = vector.extract_strided_slice %201 {offsets = [1, 0], sizes = [1, 5], strides = [1, 1]} : vector<5x5xf32> to vector<1x5xf32>
    %516 = vector.broadcast %515 : vector<1x5xf32> to vector<8x5xf32>
    %517 = arith.addf %503, %516 : vector<8x5xf32>
    %cst_114 = arith.constant dense<0xFF800000> : vector<8xf32>
    %518 = vector.multi_reduction <maximumf>, %517, %cst_114 [1] : vector<8x5xf32> to vector<8xf32>
    %519 = vector.shape_cast %518 : vector<8xf32> to vector<8x1xf32>
    %520 = vector.broadcast %519 : vector<8x1xf32> to vector<8x5xf32>
    %521 = arith.cmpf oeq, %517, %520 : vector<8x5xf32>
    %cst_115 = arith.constant 5.000000e+00 : f32
    %522 = vector.broadcast %cst_115 : f32 to vector<8x5xf32>
    %523 = arith.select %521, %203, %522 : vector<8x5xi1>, vector<8x5xf32>
    %cst_116 = arith.constant dense<0x7F800000> : vector<8xf32>
    %524 = vector.multi_reduction <minimumf>, %523, %cst_116 [1] : vector<8x5xf32> to vector<8xf32>
    %525 = vector.shape_cast %524 : vector<8xf32> to vector<8x1xf32>
    %526 = vector.extract_strided_slice %201 {offsets = [2, 0], sizes = [1, 5], strides = [1, 1]} : vector<5x5xf32> to vector<1x5xf32>
    %527 = vector.broadcast %526 : vector<1x5xf32> to vector<8x5xf32>
    %528 = arith.addf %503, %527 : vector<8x5xf32>
    %cst_117 = arith.constant dense<0xFF800000> : vector<8xf32>
    %529 = vector.multi_reduction <maximumf>, %528, %cst_117 [1] : vector<8x5xf32> to vector<8xf32>
    %530 = vector.shape_cast %529 : vector<8xf32> to vector<8x1xf32>
    %531 = vector.broadcast %530 : vector<8x1xf32> to vector<8x5xf32>
    %532 = arith.cmpf oeq, %528, %531 : vector<8x5xf32>
    %cst_118 = arith.constant 5.000000e+00 : f32
    %533 = vector.broadcast %cst_118 : f32 to vector<8x5xf32>
    %534 = arith.select %532, %203, %533 : vector<8x5xi1>, vector<8x5xf32>
    %cst_119 = arith.constant dense<0x7F800000> : vector<8xf32>
    %535 = vector.multi_reduction <minimumf>, %534, %cst_119 [1] : vector<8x5xf32> to vector<8xf32>
    %536 = vector.shape_cast %535 : vector<8xf32> to vector<8x1xf32>
    %537 = vector.extract_strided_slice %201 {offsets = [3, 0], sizes = [1, 5], strides = [1, 1]} : vector<5x5xf32> to vector<1x5xf32>
    %538 = vector.broadcast %537 : vector<1x5xf32> to vector<8x5xf32>
    %539 = arith.addf %503, %538 : vector<8x5xf32>
    %cst_120 = arith.constant dense<0xFF800000> : vector<8xf32>
    %540 = vector.multi_reduction <maximumf>, %539, %cst_120 [1] : vector<8x5xf32> to vector<8xf32>
    %541 = vector.shape_cast %540 : vector<8xf32> to vector<8x1xf32>
    %542 = vector.broadcast %541 : vector<8x1xf32> to vector<8x5xf32>
    %543 = arith.cmpf oeq, %539, %542 : vector<8x5xf32>
    %cst_121 = arith.constant 5.000000e+00 : f32
    %544 = vector.broadcast %cst_121 : f32 to vector<8x5xf32>
    %545 = arith.select %543, %203, %544 : vector<8x5xi1>, vector<8x5xf32>
    %cst_122 = arith.constant dense<0x7F800000> : vector<8xf32>
    %546 = vector.multi_reduction <minimumf>, %545, %cst_122 [1] : vector<8x5xf32> to vector<8xf32>
    %547 = vector.shape_cast %546 : vector<8xf32> to vector<8x1xf32>
    %548 = vector.extract_strided_slice %201 {offsets = [4, 0], sizes = [1, 5], strides = [1, 1]} : vector<5x5xf32> to vector<1x5xf32>
    %549 = vector.broadcast %548 : vector<1x5xf32> to vector<8x5xf32>
    %550 = arith.addf %503, %549 : vector<8x5xf32>
    %cst_123 = arith.constant dense<0xFF800000> : vector<8xf32>
    %551 = vector.multi_reduction <maximumf>, %550, %cst_123 [1] : vector<8x5xf32> to vector<8xf32>
    %552 = vector.shape_cast %551 : vector<8xf32> to vector<8x1xf32>
    %553 = vector.broadcast %552 : vector<8x1xf32> to vector<8x5xf32>
    %554 = arith.cmpf oeq, %550, %553 : vector<8x5xf32>
    %cst_124 = arith.constant 5.000000e+00 : f32
    %555 = vector.broadcast %cst_124 : f32 to vector<8x5xf32>
    %556 = arith.select %554, %203, %555 : vector<8x5xi1>, vector<8x5xf32>
    %cst_125 = arith.constant dense<0x7F800000> : vector<8xf32>
    %557 = vector.multi_reduction <minimumf>, %556, %cst_125 [1] : vector<8x5xf32> to vector<8xf32>
    %558 = vector.shape_cast %557 : vector<8xf32> to vector<8x1xf32>
    %559 = tpu.concatenate %514, %525, %536, %547, %558 in 1 : vector<8x1xf32>, vector<8x1xf32>, vector<8x1xf32>, vector<8x1xf32>, vector<8x1xf32> -> vector<8x5xf32>
    %560 = tpu.concatenate %508, %519, %530, %541, %552 in 1 : vector<8x1xf32>, vector<8x1xf32>, vector<8x1xf32>, vector<8x1xf32>, vector<8x1xf32> -> vector<8x5xf32>
    %561 = vector.extract_strided_slice %199 {offsets = [40, 0], sizes = [8, 5], strides = [1, 1]} : vector<64x5xf32> to vector<8x5xf32>
    %562 = arith.addf %560, %561 : vector<8x5xf32>
    %563 = vector.extract_strided_slice %201 {offsets = [0, 0], sizes = [1, 5], strides = [1, 1]} : vector<5x5xf32> to vector<1x5xf32>
    %564 = vector.broadcast %563 : vector<1x5xf32> to vector<8x5xf32>
    %565 = arith.addf %562, %564 : vector<8x5xf32>
    %cst_126 = arith.constant dense<0xFF800000> : vector<8xf32>
    %566 = vector.multi_reduction <maximumf>, %565, %cst_126 [1] : vector<8x5xf32> to vector<8xf32>
    %567 = vector.shape_cast %566 : vector<8xf32> to vector<8x1xf32>
    %568 = vector.broadcast %567 : vector<8x1xf32> to vector<8x5xf32>
    %569 = arith.cmpf oeq, %565, %568 : vector<8x5xf32>
    %cst_127 = arith.constant 5.000000e+00 : f32
    %570 = vector.broadcast %cst_127 : f32 to vector<8x5xf32>
    %571 = arith.select %569, %203, %570 : vector<8x5xi1>, vector<8x5xf32>
    %cst_128 = arith.constant dense<0x7F800000> : vector<8xf32>
    %572 = vector.multi_reduction <minimumf>, %571, %cst_128 [1] : vector<8x5xf32> to vector<8xf32>
    %573 = vector.shape_cast %572 : vector<8xf32> to vector<8x1xf32>
    %574 = vector.extract_strided_slice %201 {offsets = [1, 0], sizes = [1, 5], strides = [1, 1]} : vector<5x5xf32> to vector<1x5xf32>
    %575 = vector.broadcast %574 : vector<1x5xf32> to vector<8x5xf32>
    %576 = arith.addf %562, %575 : vector<8x5xf32>
    %cst_129 = arith.constant dense<0xFF800000> : vector<8xf32>
    %577 = vector.multi_reduction <maximumf>, %576, %cst_129 [1] : vector<8x5xf32> to vector<8xf32>
    %578 = vector.shape_cast %577 : vector<8xf32> to vector<8x1xf32>
    %579 = vector.broadcast %578 : vector<8x1xf32> to vector<8x5xf32>
    %580 = arith.cmpf oeq, %576, %579 : vector<8x5xf32>
    %cst_130 = arith.constant 5.000000e+00 : f32
    %581 = vector.broadcast %cst_130 : f32 to vector<8x5xf32>
    %582 = arith.select %580, %203, %581 : vector<8x5xi1>, vector<8x5xf32>
    %cst_131 = arith.constant dense<0x7F800000> : vector<8xf32>
    %583 = vector.multi_reduction <minimumf>, %582, %cst_131 [1] : vector<8x5xf32> to vector<8xf32>
    %584 = vector.shape_cast %583 : vector<8xf32> to vector<8x1xf32>
    %585 = vector.extract_strided_slice %201 {offsets = [2, 0], sizes = [1, 5], strides = [1, 1]} : vector<5x5xf32> to vector<1x5xf32>
    %586 = vector.broadcast %585 : vector<1x5xf32> to vector<8x5xf32>
    %587 = arith.addf %562, %586 : vector<8x5xf32>
    %cst_132 = arith.constant dense<0xFF800000> : vector<8xf32>
    %588 = vector.multi_reduction <maximumf>, %587, %cst_132 [1] : vector<8x5xf32> to vector<8xf32>
    %589 = vector.shape_cast %588 : vector<8xf32> to vector<8x1xf32>
    %590 = vector.broadcast %589 : vector<8x1xf32> to vector<8x5xf32>
    %591 = arith.cmpf oeq, %587, %590 : vector<8x5xf32>
    %cst_133 = arith.constant 5.000000e+00 : f32
    %592 = vector.broadcast %cst_133 : f32 to vector<8x5xf32>
    %593 = arith.select %591, %203, %592 : vector<8x5xi1>, vector<8x5xf32>
    %cst_134 = arith.constant dense<0x7F800000> : vector<8xf32>
    %594 = vector.multi_reduction <minimumf>, %593, %cst_134 [1] : vector<8x5xf32> to vector<8xf32>
    %595 = vector.shape_cast %594 : vector<8xf32> to vector<8x1xf32>
    %596 = vector.extract_strided_slice %201 {offsets = [3, 0], sizes = [1, 5], strides = [1, 1]} : vector<5x5xf32> to vector<1x5xf32>
    %597 = vector.broadcast %596 : vector<1x5xf32> to vector<8x5xf32>
    %598 = arith.addf %562, %597 : vector<8x5xf32>
    %cst_135 = arith.constant dense<0xFF800000> : vector<8xf32>
    %599 = vector.multi_reduction <maximumf>, %598, %cst_135 [1] : vector<8x5xf32> to vector<8xf32>
    %600 = vector.shape_cast %599 : vector<8xf32> to vector<8x1xf32>
    %601 = vector.broadcast %600 : vector<8x1xf32> to vector<8x5xf32>
    %602 = arith.cmpf oeq, %598, %601 : vector<8x5xf32>
    %cst_136 = arith.constant 5.000000e+00 : f32
    %603 = vector.broadcast %cst_136 : f32 to vector<8x5xf32>
    %604 = arith.select %602, %203, %603 : vector<8x5xi1>, vector<8x5xf32>
    %cst_137 = arith.constant dense<0x7F800000> : vector<8xf32>
    %605 = vector.multi_reduction <minimumf>, %604, %cst_137 [1] : vector<8x5xf32> to vector<8xf32>
    %606 = vector.shape_cast %605 : vector<8xf32> to vector<8x1xf32>
    %607 = vector.extract_strided_slice %201 {offsets = [4, 0], sizes = [1, 5], strides = [1, 1]} : vector<5x5xf32> to vector<1x5xf32>
    %608 = vector.broadcast %607 : vector<1x5xf32> to vector<8x5xf32>
    %609 = arith.addf %562, %608 : vector<8x5xf32>
    %cst_138 = arith.constant dense<0xFF800000> : vector<8xf32>
    %610 = vector.multi_reduction <maximumf>, %609, %cst_138 [1] : vector<8x5xf32> to vector<8xf32>
    %611 = vector.shape_cast %610 : vector<8xf32> to vector<8x1xf32>
    %612 = vector.broadcast %611 : vector<8x1xf32> to vector<8x5xf32>
    %613 = arith.cmpf oeq, %609, %612 : vector<8x5xf32>
    %cst_139 = arith.constant 5.000000e+00 : f32
    %614 = vector.broadcast %cst_139 : f32 to vector<8x5xf32>
    %615 = arith.select %613, %203, %614 : vector<8x5xi1>, vector<8x5xf32>
    %cst_140 = arith.constant dense<0x7F800000> : vector<8xf32>
    %616 = vector.multi_reduction <minimumf>, %615, %cst_140 [1] : vector<8x5xf32> to vector<8xf32>
    %617 = vector.shape_cast %616 : vector<8xf32> to vector<8x1xf32>
    %618 = tpu.concatenate %573, %584, %595, %606, %617 in 1 : vector<8x1xf32>, vector<8x1xf32>, vector<8x1xf32>, vector<8x1xf32>, vector<8x1xf32> -> vector<8x5xf32>
    %619 = tpu.concatenate %567, %578, %589, %600, %611 in 1 : vector<8x1xf32>, vector<8x1xf32>, vector<8x1xf32>, vector<8x1xf32>, vector<8x1xf32> -> vector<8x5xf32>
    %620 = vector.extract_strided_slice %199 {offsets = [48, 0], sizes = [8, 5], strides = [1, 1]} : vector<64x5xf32> to vector<8x5xf32>
    %621 = arith.addf %619, %620 : vector<8x5xf32>
    %622 = vector.extract_strided_slice %201 {offsets = [0, 0], sizes = [1, 5], strides = [1, 1]} : vector<5x5xf32> to vector<1x5xf32>
    %623 = vector.broadcast %622 : vector<1x5xf32> to vector<8x5xf32>
    %624 = arith.addf %621, %623 : vector<8x5xf32>
    %cst_141 = arith.constant dense<0xFF800000> : vector<8xf32>
    %625 = vector.multi_reduction <maximumf>, %624, %cst_141 [1] : vector<8x5xf32> to vector<8xf32>
    %626 = vector.shape_cast %625 : vector<8xf32> to vector<8x1xf32>
    %627 = vector.broadcast %626 : vector<8x1xf32> to vector<8x5xf32>
    %628 = arith.cmpf oeq, %624, %627 : vector<8x5xf32>
    %cst_142 = arith.constant 5.000000e+00 : f32
    %629 = vector.broadcast %cst_142 : f32 to vector<8x5xf32>
    %630 = arith.select %628, %203, %629 : vector<8x5xi1>, vector<8x5xf32>
    %cst_143 = arith.constant dense<0x7F800000> : vector<8xf32>
    %631 = vector.multi_reduction <minimumf>, %630, %cst_143 [1] : vector<8x5xf32> to vector<8xf32>
    %632 = vector.shape_cast %631 : vector<8xf32> to vector<8x1xf32>
    %633 = vector.extract_strided_slice %201 {offsets = [1, 0], sizes = [1, 5], strides = [1, 1]} : vector<5x5xf32> to vector<1x5xf32>
    %634 = vector.broadcast %633 : vector<1x5xf32> to vector<8x5xf32>
    %635 = arith.addf %621, %634 : vector<8x5xf32>
    %cst_144 = arith.constant dense<0xFF800000> : vector<8xf32>
    %636 = vector.multi_reduction <maximumf>, %635, %cst_144 [1] : vector<8x5xf32> to vector<8xf32>
    %637 = vector.shape_cast %636 : vector<8xf32> to vector<8x1xf32>
    %638 = vector.broadcast %637 : vector<8x1xf32> to vector<8x5xf32>
    %639 = arith.cmpf oeq, %635, %638 : vector<8x5xf32>
    %cst_145 = arith.constant 5.000000e+00 : f32
    %640 = vector.broadcast %cst_145 : f32 to vector<8x5xf32>
    %641 = arith.select %639, %203, %640 : vector<8x5xi1>, vector<8x5xf32>
    %cst_146 = arith.constant dense<0x7F800000> : vector<8xf32>
    %642 = vector.multi_reduction <minimumf>, %641, %cst_146 [1] : vector<8x5xf32> to vector<8xf32>
    %643 = vector.shape_cast %642 : vector<8xf32> to vector<8x1xf32>
    %644 = vector.extract_strided_slice %201 {offsets = [2, 0], sizes = [1, 5], strides = [1, 1]} : vector<5x5xf32> to vector<1x5xf32>
    %645 = vector.broadcast %644 : vector<1x5xf32> to vector<8x5xf32>
    %646 = arith.addf %621, %645 : vector<8x5xf32>
    %cst_147 = arith.constant dense<0xFF800000> : vector<8xf32>
    %647 = vector.multi_reduction <maximumf>, %646, %cst_147 [1] : vector<8x5xf32> to vector<8xf32>
    %648 = vector.shape_cast %647 : vector<8xf32> to vector<8x1xf32>
    %649 = vector.broadcast %648 : vector<8x1xf32> to vector<8x5xf32>
    %650 = arith.cmpf oeq, %646, %649 : vector<8x5xf32>
    %cst_148 = arith.constant 5.000000e+00 : f32
    %651 = vector.broadcast %cst_148 : f32 to vector<8x5xf32>
    %652 = arith.select %650, %203, %651 : vector<8x5xi1>, vector<8x5xf32>
    %cst_149 = arith.constant dense<0x7F800000> : vector<8xf32>
    %653 = vector.multi_reduction <minimumf>, %652, %cst_149 [1] : vector<8x5xf32> to vector<8xf32>
    %654 = vector.shape_cast %653 : vector<8xf32> to vector<8x1xf32>
    %655 = vector.extract_strided_slice %201 {offsets = [3, 0], sizes = [1, 5], strides = [1, 1]} : vector<5x5xf32> to vector<1x5xf32>
    %656 = vector.broadcast %655 : vector<1x5xf32> to vector<8x5xf32>
    %657 = arith.addf %621, %656 : vector<8x5xf32>
    %cst_150 = arith.constant dense<0xFF800000> : vector<8xf32>
    %658 = vector.multi_reduction <maximumf>, %657, %cst_150 [1] : vector<8x5xf32> to vector<8xf32>
    %659 = vector.shape_cast %658 : vector<8xf32> to vector<8x1xf32>
    %660 = vector.broadcast %659 : vector<8x1xf32> to vector<8x5xf32>
    %661 = arith.cmpf oeq, %657, %660 : vector<8x5xf32>
    %cst_151 = arith.constant 5.000000e+00 : f32
    %662 = vector.broadcast %cst_151 : f32 to vector<8x5xf32>
    %663 = arith.select %661, %203, %662 : vector<8x5xi1>, vector<8x5xf32>
    %cst_152 = arith.constant dense<0x7F800000> : vector<8xf32>
    %664 = vector.multi_reduction <minimumf>, %663, %cst_152 [1] : vector<8x5xf32> to vector<8xf32>
    %665 = vector.shape_cast %664 : vector<8xf32> to vector<8x1xf32>
    %666 = vector.extract_strided_slice %201 {offsets = [4, 0], sizes = [1, 5], strides = [1, 1]} : vector<5x5xf32> to vector<1x5xf32>
    %667 = vector.broadcast %666 : vector<1x5xf32> to vector<8x5xf32>
    %668 = arith.addf %621, %667 : vector<8x5xf32>
    %cst_153 = arith.constant dense<0xFF800000> : vector<8xf32>
    %669 = vector.multi_reduction <maximumf>, %668, %cst_153 [1] : vector<8x5xf32> to vector<8xf32>
    %670 = vector.shape_cast %669 : vector<8xf32> to vector<8x1xf32>
    %671 = vector.broadcast %670 : vector<8x1xf32> to vector<8x5xf32>
    %672 = arith.cmpf oeq, %668, %671 : vector<8x5xf32>
    %cst_154 = arith.constant 5.000000e+00 : f32
    %673 = vector.broadcast %cst_154 : f32 to vector<8x5xf32>
    %674 = arith.select %672, %203, %673 : vector<8x5xi1>, vector<8x5xf32>
    %cst_155 = arith.constant dense<0x7F800000> : vector<8xf32>
    %675 = vector.multi_reduction <minimumf>, %674, %cst_155 [1] : vector<8x5xf32> to vector<8xf32>
    %676 = vector.shape_cast %675 : vector<8xf32> to vector<8x1xf32>
    %677 = tpu.concatenate %632, %643, %654, %665, %676 in 1 : vector<8x1xf32>, vector<8x1xf32>, vector<8x1xf32>, vector<8x1xf32>, vector<8x1xf32> -> vector<8x5xf32>
    %678 = tpu.concatenate %626, %637, %648, %659, %670 in 1 : vector<8x1xf32>, vector<8x1xf32>, vector<8x1xf32>, vector<8x1xf32>, vector<8x1xf32> -> vector<8x5xf32>
    %679 = vector.extract_strided_slice %199 {offsets = [56, 0], sizes = [8, 5], strides = [1, 1]} : vector<64x5xf32> to vector<8x5xf32>
    %680 = arith.addf %678, %679 : vector<8x5xf32>
    %681 = tpu.concatenate %264, %323, %382, %441, %500, %559, %618, %677 in 0 : vector<8x5xf32>, vector<8x5xf32>, vector<8x5xf32>, vector<8x5xf32>, vector<8x5xf32>, vector<8x5xf32>, vector<8x5xf32>, vector<8x5xf32> -> vector<64x5xf32>
    %682 = arith.fptosi %681 : vector<64x5xf32> to vector<64x5xi32>
    %c0_156 = arith.constant 0 : index
    %c0_157 = arith.constant 0 : index
    %683 = vector.load %arg9[%c0_156, %c0_157] : memref<64x5xi32, #tpu.memory_space<vmem>>, vector<64x5xi32>
    tpu.vector_store %arg9[%c0_156, %c0_157], %682 {strides = array<i32>} : memref<64x5xi32, #tpu.memory_space<vmem>>, vector<64x5xi32>,
    %684 = vector.extract_strided_slice %201 {offsets = [4, 0], sizes = [1, 5], strides = [1, 1]} : vector<5x5xf32> to vector<1x5xf32>
    %685 = vector.broadcast %684 : vector<1x5xf32> to vector<8x5xf32>
    %686 = arith.addf %680, %685 : vector<8x5xf32>
    %cst_158 = arith.constant dense<0xFF800000> : vector<8xf32>
    %687 = vector.multi_reduction <maximumf>, %686, %cst_158 [1] : vector<8x5xf32> to vector<8xf32>
    %688 = vector.shape_cast %687 : vector<8xf32> to vector<8x1xf32>
    %689 = vector.broadcast %688 : vector<8x1xf32> to vector<8x5xf32>
    %690 = arith.cmpf oeq, %686, %689 : vector<8x5xf32>
    %cst_159 = arith.constant 5.000000e+00 : f32
    %691 = vector.broadcast %cst_159 : f32 to vector<8x5xf32>
    %692 = arith.select %690, %203, %691 : vector<8x5xi1>, vector<8x5xf32>
    %cst_160 = arith.constant dense<0x7F800000> : vector<8xf32>
    %693 = vector.multi_reduction <minimumf>, %692, %cst_160 [1] : vector<8x5xf32> to vector<8xf32>
    %694 = vector.shape_cast %693 : vector<8xf32> to vector<8x1xf32>
    %c0_161 = arith.constant 0 : index
    %c0_162 = arith.constant 0 : index
    %695 = vector.load %arg10[%c0_161, %c0_162] : memref<8x1xf32, #tpu.memory_space<vmem>>, vector<8x1xf32>
    tpu.vector_store %arg10[%c0_161, %c0_162], %688 {strides = array<i32>} : memref<8x1xf32, #tpu.memory_space<vmem>>, vector<8x1xf32>,
    %696 = arith.fptosi %694 : vector<8x1xf32> to vector<8x1xi32>
    %c0_163 = arith.constant 0 : index
    %c0_164 = arith.constant 0 : index
    %697 = vector.load %arg11[%c0_163, %c0_164] : memref<8x1xi32, #tpu.memory_space<vmem>>, vector<8x1xi32>
    tpu.vector_store %arg11[%c0_163, %c0_164], %696 {strides = array<i32>} : memref<8x1xi32, #tpu.memory_space<vmem>>, vector<8x1xi32>,
    return
  }
  func.func @transform_0(%arg0: i32) -> (i32, i32) {
    %c0_i32 = arith.constant 0 : i32
    %c0_i32_0 = arith.constant 0 : i32
    return %arg0, %c0_i32 : i32, i32
  }
  func.func @transform_1(%arg0: i32) -> (i32, i32) {
    %c0_i32 = arith.constant 0 : i32
    %c0_i32_0 = arith.constant 0 : i32
    %c0_i32_1 = arith.constant 0 : i32
    return %c0_i32, %c0_i32_0 : i32, i32
  }
  func.func @transform_2(%arg0: i32) -> (i32, i32) {
    %c0_i32 = arith.constant 0 : i32
    %c0_i32_0 = arith.constant 0 : i32
    %c0_i32_1 = arith.constant 0 : i32
    return %c0_i32, %c0_i32_0 : i32, i32
  }
  func.func @transform_3(%arg0: i32) -> (i32, i32) {
    %c0_i32 = arith.constant 0 : i32
    %c0_i32_0 = arith.constant 0 : i32
    %c0_i32_1 = arith.constant 0 : i32
    return %c0_i32, %c0_i32_0 : i32, i32
  }
  func.func @transform_4(%arg0: i32) -> (i32, i32) {
    %c0_i32 = arith.constant 0 : i32
    %c0_i32_0 = arith.constant 0 : i32
    %c0_i32_1 = arith.constant 0 : i32
    return %c0_i32, %c0_i32_0 : i32, i32
  }
  func.func @transform_5(%arg0: i32) -> (i32, i32) {
    %c0_i32 = arith.constant 0 : i32
    %c0_i32_0 = arith.constant 0 : i32
    %c0_i32_1 = arith.constant 0 : i32
    return %c0_i32, %c0_i32_0 : i32, i32
  }
  func.func @transform_6(%arg0: i32) -> (i32, i32) {
    %c0_i32 = arith.constant 0 : i32
    %c0_i32_0 = arith.constant 0 : i32
    %c0_i32_1 = arith.constant 0 : i32
    return %c0_i32, %c0_i32_0 : i32, i32
  }
  func.func @transform_7(%arg0: i32) -> (i32, i32) {
    %c0_i32 = arith.constant 0 : i32
    %c0_i32_0 = arith.constant 0 : i32
    return %arg0, %c0_i32 : i32, i32
  }
  func.func @transform_8(%arg0: i32) -> (i32, i32) {
    %c0_i32 = arith.constant 0 : i32
    %c0_i32_0 = arith.constant 0 : i32
    return %arg0, %c0_i32 : i32, i32
  }
  func.func @transform_9(%arg0: i32) -> (i32, i32) {
    %c0_i32 = arith.constant 0 : i32
    %c0_i32_0 = arith.constant 0 : i32
    return %arg0, %c0_i32 : i32, i32
  }
  func.func @transform_10(%arg0: i32) -> (i32, i32) {
    %c0_i32 = arith.constant 0 : i32
    %c0_i32_0 = arith.constant 0 : i32
    return %arg0, %c0_i32 : i32, i32
  }
}

</mosaic_0001>

<bundles_post_ra>
// kernel: tpu_custom_call.1
= control target key start
LH: loop header
LB: loop body
LE: loop exit
PB: predicated region body
PF: predicated region fallthrough
CT: control target
= control target key end

     0   :  { %s2294_s13 = smov 0   ;;  %s3158_s0 = inlined_call_operand.vmem [shape: bf16[128,48], index: 0, kind: input, shape index: {}]   ;;  %s3159_s1 = inlined_call_operand.vmem [shape: bf16[48,128], index: 1, kind: input, shape index: {}]   ;;  %s3160_s2 = inlined_call_operand.vmem [shape: bf16[32,128], index: 2, kind: input, shape index: {}]   ;;  %s3161_s3 = inlined_call_operand.vmem [shape: f32[1,128], index: 3, kind: input, shape index: {}]   ;;  %s3162_s4 = inlined_call_operand.vmem [shape: bf16[32,5], index: 4, kind: input, shape index: {}]   ;;  %s3163_s5 = inlined_call_operand.vmem [shape: f32[1,5], index: 5, kind: input, shape index: {}]   ;;  %s3164_s6 = inlined_call_operand.vmem [shape: f32[5,5], index: 6, kind: input, shape index: {}]   ;;  %s3165_s7 = inlined_call_operand.vmem [shape: f32[128,5], index: 7, kind: output, shape index: {0}]   ;;  %s3166_s8 = inlined_call_operand.vmem [shape: s32[128,5], index: 8, kind: output, shape index: {1}]   ;;  %s3167_s9 = inlined_call_operand.vmem [shape: f32[16,1], index: 9, kind: output, shape index: {2}]   ;;  %s3168_s10 = inlined_call_operand.vmem [shape: s32[16,1], index: 10, kind: output, shape index: {3}]  }
   0x1 LB: > { %s2300_s14 = sadd.s32 4294967295, %s2231_s13   ;;  %p1924_p0 = scmp.ge.s32.totalorder %s2231_s13, 1  ;;  %s2231_s13 = sphi %s2294_s13, %s21_s13  }
   0x2   : > { %p320_p1 = scmp.lt.s32.totalorder %s2231_s13, 3 }
   0x4   : > { %p321_p2 = pnand %p1924_p0, %p320_p1 }
   0x6   : > { %324 = sbr.rel (%p321_p2) target bundleno = 7287 (0x1c77), region = 48 }
   0xd   : > { %v2150_v0 = vld [vmem:[%s3159_s1] sm:$0xff]   ;;  %s1925_s17 = sshll.u32 %s2300_s14, 3  ;;  %v2151_v1 = vld [vmem:[%s3159_s1 + $0x8] sm:$0xff]   ;;  %v2152_v2 = vld [vmem:[%s3159_s1 + $0x10] sm:$0xff]   ;;  %v2233_v4 = vmov 0.0   ;;  %vm457_vm0 = vcmask 392192  }
   0xe   : > { %p372_p3 = scmp.lt.s32.totalorder %s1925_s17, 15  ;;  %2008 = vmatprep.subr.bf16.mxu0 %v2150_v0  ;;  %v2319_v3 = vld [vmem:[%s3160_s2] sm:$0xff]   ;;  %2030 = vmatprep.subr.bf16.mxu1 %v2233_v4  ;;  %vm2234_vm1 = vmmov 0   ;;  %v2333_v6 = vld [vmem:[%s3160_s2 + $0x8] sm:$0xff]   ;;  %v2235_v10 = vmov 0   ;;  %s2236_s12 = smov 32  }
   0xf   : > { %2009 = vmatpush3.bf16.msra.mxu0 %v2150_v0  ;;  %2034 = vmatprep.mubr.msk.bf16.mxu1 %vm2234_vm1, %v2233_v4  ;;  %v1933_v11 = vld [vmem:[%s3161_s3] ss:$0 sm:$0xff]  ;;  %s2237_s15 = smov 64   ;;  %vm551_vm2 = vcmask 261120   ;;  %vm1269_vm4 = vcmask 39936   ;;  %vm1132_vm5 = vcmask 130048  }
  0x10   : > { %s3239_s17 = smov (!%p372_p3, %s1925_s17), 15  ;;  %2010 = vmatprep.subr.bf16.mxu0 %v2151_v1  ;;  %2031 = vmatpush3.bf16.msra.mxu1 %v2319_v3  ;;  %vm1349_vm6 = vcmask 7168   ;;  %vm1351_vm7 = vcmask 15360   ;;  %vm1353_vm8 = vcmask 23552   ;;  %vm1355_vm9 = vcmask 31744   ;;  %p389_p4 = scmp.lt.s32.totalorder %s2300_s14, 1 }
  0x11   : > { %s1926_s24 = sshll.u32 %s3239_s17, 2  ;;  %2032 = vmatprep.subr.bf16.mxu1 %v2233_v4  ;;  %s1928_s23 = sshll.u32 %s3239_s17, 3 }
  0x12   : > { %s375_s27 = scalar_lea.vmem %s3158_s0, %s1926_s24  ;;  %s2560_s28 = scalar_lea.vmem %s3165_s7, %s1928_s23 }
  0x13   : > { %2011 = vmatpush3.bf16.msra.mxu0 %v2151_v1  ;;  %v2153_v5 = vld [vmem:[%s375_s27] sm:$0xff]   ;;  %v2154_v7 = vld [vmem:[%s375_s27 + $0x8] sm:$0xff]   ;;  %v2156_v8 = vld [vmem:[%s375_s27 + $0x10] sm:$0xff]   ;;  %s3241_s14 = smov (!%p389_p4, %s2300_s14), 1  ;;  %s3102_s18 = scalar_lea.vmem %s3166_s8, %s1928_s23 }
  0x14   : > { %2012 = vmatprep.subr.bf16.mxu0 %v2152_v2  ;;  %2014 = vmatprep.mubr.msk.bf16.mxu0 %vm457_vm0, %v2153_v5  ;;  %v2157_v9 = vld [vmem:[%s375_s27 + $0x18] sm:$0xff]   ;;  %s1931_s29 = sshll.u32 %s3241_s14, 3 }
  0x15   : > { %2033 = vmatpush3.bf16.msra.mxu1 %v2333_v6  ;;  %s396_s20 = scalar_lea.vmem %s3168_s10, %s1931_s29 }
  0x16   : > { %2038 = vmatprep.subr.bf16.mxu1 %v2233_v4 }
  0x17   : > { %2013 = vmatpush3.bf16.msra.mxu0 %v2152_v2 }
  0x18   : > { %2022 = vmatprep.subr.bf16.mxu0 %v2233_v4 }
  0x1a   : > { %2015 = vmatmul.mubr.msk.bf16.vlgmr.msra.gmra.mrb[0].mxu0 %vm457_vm0, %v2154_v7 }
  0x1b   : > { %2023 = vmatpush3.bf16.msra.mxu0 %v2319_v3  ;;  %2018 = vmatprep.mubr.msk.bf16.mxu0 %vm457_vm0, %v2156_v8 }
  0x1c   : > { %2024 = vmatprep.subr.bf16.mxu0 %v2233_v4 }
  0x1f   : > { %2025 = vmatpush3.bf16.msra.mxu0 %v2333_v6 }
  0x20   : > { %2046 = vmatprep.subr.bf16.mxu0 %v2233_v4 }
  0x22   : > { %2019 = vmatmul.mubr.msk.bf16.gmra.mrb[4].mxu0 %vm457_vm0, %v2157_v9 }
  0x23   : > { %2026 = vmatprep.mubr.msk.bf16.mxu0 %vm2234_vm1, %v2233_v4 }
  0x2a   : > { %2027 = vmatmul.mubr.bf16.vlgmr.msra.gmra.mrb[8].mxu0 %v2235_v10 }
  0x2b   : > { %2047 = vmatpush3.bf16.msra.mxu0 %v2319_v3  ;;  %2050 = vmatprep.mubr.msk.bf16.mxu0 %vm2234_vm1, %v2233_v4 }
  0x2c   : > { %2048 = vmatprep.subr.bf16.mxu0 %v2233_v4 }
  0x2f   : > { %2049 = vmatpush3.bf16.msra.mxu0 %v2333_v6 }
  0x30   : > { %2062 = vmatprep.subr.bf16.mxu0 %v2233_v4 }
  0xed   : > { %v2016_v12 = vpop.f32.mrb[0].mxu0 }
  0xee   : > { %v2357_v13 = vadd.f32 %v2016_v12, %v1933_v11  ;;  %v504_v14 = vpop.f32.mrb[1].mxu0 }
  0xef   : > { %v2017_v15 = vpop.f32.mrb[2].mxu0  ;;  %v505_v27 = vadd.f32 %v1933_v11, %v504_v14 }
  0xf0   : > { %v2359_v16 = vadd.f32 %v2017_v15, %v1933_v11  ;;  %v507_v17 = vpop.f32.mrb[3].mxu0 }
  0xf1   : > { %v508_v18 = vadd.f32 %v1933_v11, %v507_v17 }
  0xf5   : > { %v2020_v19 = vpop.f32.mrb[4].mxu0 }
  0xf6   : > { %v2361_v20 = vadd.f32 %v2020_v19, %v1933_v11  ;;  %v520_v21 = vpop.f32.mrb[5].mxu0 }
  0xf7   : > { %v2363_v22 = vadd.f32 %v1933_v11, %v520_v21  ;;  %v2021_v23 = vpop.f32.mrb[6].mxu0 }
  0xf8   : > { %v2365_v24 = vadd.f32 %v2021_v23, %v1933_v11  ;;  %v523_v25 = vpop.f32.mrb[7].mxu0 }
  0xf9   : > { %v2367_v26 = vadd.f32 %v1933_v11, %v523_v25 }
  0xfd   : > { %v589_v28 = vpop.f32.mrb[8].mxu0 }
  0xfe   : > { %v595_v29 = vadd.f32 %v589_v28, %v505_v27  ;;  %v2028_v30 = vpop.f32.mrb[9].mxu0 }
  0xff   : > { %v592_v31 = vpop.f32.mrb[10].mxu0 }
 0x100   : > { %2161 = vtanh.f32 %v595_v29  ;;  %v2029_v32 = vpop.f32.mrb[11].mxu0  ;;  %v1947_v34 = vmul.f32 -1.442695, %v595_v29 }
 0x102   : > { %2163 = vpow2.f32 %v1947_v34 }
 0x10a   : > { %v2162_v33 = vpop.eup %2161 }
 0x10b   : > { %605 = vrot.lane.b32.xlu0 %v2162_v33, %s2236_s12 }
 0x10c   : > { %v2164_v35 = vpop.eup %2163 }
 0x10d   : > { %v599_v36 = vadd.f32 1.0, %v2164_v35 }
 0x10f   : > { %2165 = vrcp.f32 %v599_v36 }
 0x119   : > { %v2166_v37 = vpop.eup %2165 }
 0x11a   : > { %v603_v40 = vmul.f32 0.0, %v2166_v37 }
 0x17d   : > { %v606_v38 = vpop.permute.xlu0 %605 }
 0x17e   : > { %v608_v39 = vmul.f32 %v2166_v37, %v606_v38 }
 0x180   : > { %610 = vrot.lane.b32.xlu0 %v608_v39, %s2236_s12 }
 0x1f2   : > { %v611_v41 = vpop.permute.xlu0 %610 }
 0x1f3   : > { %v613_v42 = vadd.f32 %v611_v41, %v603_v40 }
 0x1f5   : > { %2167 = vtanh.f32 %v613_v42 }
 0x1ff   : > { %v2168_v43 = vpop.eup %2167 }
 0x200   : > { %616 = vrot.lane.b32.xlu1 %v2168_v43, %s2236_s12 }
 0x272   : > { %v617_v44 = vpop.permute.xlu1 %616 }
 0x273   : > { %v2372_v45 = vmul.f32 %v2166_v37, %v617_v44 }
 0x275   : > { %v620_v46 = vpack.c.bf16 %v2372_v45, %v2372_v45 }
 0x277   : > { %622 = vrot.lane.b32.xlu1 %v620_v46, %s2237_s15 }
 0x2e9   : > { %v623_v47 = vpop.permute.xlu1 %622 }
 0x2ea   : > { %2035 = vmatmul.mubr.msk.bf16.vlgmr.msra.gmra.mrb[0].mxu1 %vm551_vm2, %v623_v47 }
 0x2eb   : > { %2039 = vmatpush3.bf16.msra.mxu1 %v2319_v3  ;;  %2042 = vmatprep.mubr.msk.bf16.mxu1 %vm2234_vm1, %v2233_v4 }
 0x2ec   : > { %2040 = vmatprep.subr.bf16.mxu1 %v2233_v4 }
 0x2ef   : > { %2041 = vmatpush3.bf16.msra.mxu1 %v2333_v6 }
 0x2f0   : > { %2054 = vmatprep.subr.bf16.mxu1 %v2233_v4 }
 0x3bd   : > { %v661_v48 = vpop.f32.mrb[0].mxu1 }
 0x3be   : > { %v667_v49 = vadd.f32 %v661_v48, %v508_v18  ;;  %v2036_v50 = vpop.f32.mrb[1].mxu1 }
 0x3bf   : > { %v664_v51 = vpop.f32.mrb[2].mxu1 }
 0x3c0   : > { %2169 = vtanh.f32 %v667_v49  ;;  %v2037_v52 = vpop.f32.mrb[3].mxu1  ;;  %v1949_v54 = vmul.f32 -1.442695, %v667_v49 }
 0x3c2   : > { %2171 = vpow2.f32 %v1949_v54 }
 0x3ca   : > { %v2170_v53 = vpop.eup %2169 }
 0x3cb   : > { %677 = vrot.lane.b32.xlu0 %v2170_v53, %s2236_s12 }
 0x3cc   : > { %v2172_v55 = vpop.eup %2171 }
 0x3cd   : > { %v671_v56 = vadd.f32 1.0, %v2172_v55 }
 0x3cf   : > { %2173 = vrcp.f32 %v671_v56 }
 0x3d9   : > { %v2174_v57 = vpop.eup %2173 }
 0x3da   : > { %v675_v60 = vmul.f32 %v2174_v57, %v613_v42 }
 0x43d   : > { %v678_v58 = vpop.permute.xlu0 %677 }
 0x43e   : > { %v680_v59 = vmul.f32 %v2174_v57, %v678_v58 }
 0x440   : > { %682 = vrot.lane.b32.xlu1 %v680_v59, %s2236_s12 }
 0x4b2   : > { %v683_v61 = vpop.permute.xlu1 %682 }
 0x4b3   : > { %v685_v62 = vadd.f32 %v683_v61, %v675_v60 }
 0x4b5   : > { %2175 = vtanh.f32 %v685_v62 }
 0x4bf   : > { %v2176_v63 = vpop.eup %2175 }
 0x4c0   : > { %688 = vrot.lane.b32.xlu0 %v2176_v63, %s2236_s12 }
 0x532   : > { %v689_v0 = vpop.permute.xlu0 %688 }
 0x533   : > { %v2387_v1 = vmul.f32 %v2174_v57, %v689_v0 }
 0x535   : > { %v692_v2 = vpack.c.bf16 %v2387_v1, %v2387_v1 }
 0x537   : > { %694 = vrot.lane.b32.xlu1 %v692_v2, %s2237_s15 }
 0x5a9   : > { %v695_v5 = vpop.permute.xlu1 %694 }
 0x5aa   : > { %2043 = vmatmul.mubr.msk.bf16.vlgmr.msra.gmra.mrb[4].mxu1 %vm551_vm2, %v695_v5 }
 0x5ab   : > { %2055 = vmatpush3.bf16.msra.mxu1 %v2319_v3  ;;  %2058 = vmatprep.mubr.msk.bf16.mxu1 %vm2234_vm1, %v2233_v4 }
 0x5ac   : > { %2056 = vmatprep.subr.bf16.mxu1 %v2233_v4 }
 0x5af   : > { %2057 = vmatpush3.bf16.msra.mxu1 %v2333_v6 }
 0x5b0   : > { %2070 = vmatprep.subr.bf16.mxu1 %v2233_v4 }
 0x67d   : > { %v733_v7 = vpop.f32.mrb[4].mxu1 }
 0x67e   : > { %v739_v8 = vadd.f32 %v733_v7, %v2357_v13  ;;  %v2044_v9 = vpop.f32.mrb[5].mxu1 }
 0x67f   : > { %v736_v10 = vpop.f32.mrb[6].mxu1 }
 0x680   : > { %2177 = vtanh.f32 %v739_v8  ;;  %v2045_v11 = vpop.f32.mrb[7].mxu1  ;;  %v1951_v14 = vmul.f32 -1.442695, %v739_v8 }
 0x682   : > { %2179 = vpow2.f32 %v1951_v14 }
 0x68a   : > { %v2178_v12 = vpop.eup %2177 }
 0x68b   : > { %749 = vrot.lane.b32.xlu0 %v2178_v12, %s2236_s12 }
 0x68c   : > { %v2180_v15 = vpop.eup %2179 }
 0x68d   : > { %v743_v17 = vadd.f32 1.0, %v2180_v15 }
 0x68f   : > { %2181 = vrcp.f32 %v743_v17 }
 0x699   : > { %v2182_v18 = vpop.eup %2181 }
 0x69a   : > { %v747_v23 = vmul.f32 %v2182_v18, %v685_v62 }
 0x6fd   : > { %v750_v19 = vpop.permute.xlu0 %749 }
 0x6fe   : > { %v752_v21 = vmul.f32 %v2182_v18, %v750_v19 }
 0x700   : > { %754 = vrot.lane.b32.xlu1 %v752_v21, %s2236_s12 }
 0x772   : > { %v755_v25 = vpop.permute.xlu1 %754 }
 0x773   : > { %v757_v13 = vadd.f32 %v755_v25, %v747_v23 }
 0x775   : > { %2183 = vtanh.f32 %v757_v13 }
 0x77f   : > { %v2184_v27 = vpop.eup %2183 }
 0x780   : > { %760 = vrot.lane.b32.xlu0 %v2184_v27, %s2236_s12 }
 0x7f2   : > { %v761_v28 = vpop.permute.xlu0 %760 }
 0x7f3   : > { %v2403_v29 = vmul.f32 %v2182_v18, %v761_v28 }
 0x7f5   : > { %v764_v30 = vpack.c.bf16 %v2403_v29, %v2403_v29 }
 0x7f7   : > { %766 = vrot.lane.b32.xlu1 %v764_v30, %s2237_s15 }
 0x869   : > { %v767_v31 = vpop.permute.xlu1 %766 }
 0x86a   : > { %2051 = vmatmul.mubr.msk.bf16.vlgmr.msra.gmra.mrb[12].mxu0 %vm551_vm2, %v767_v31 }
 0x86b   : > { %2063 = vmatpush3.bf16.msra.mxu0 %v2319_v3  ;;  %2066 = vmatprep.mubr.msk.bf16.mxu0 %vm2234_vm1, %v2233_v4 }
 0x86c   : > { %2064 = vmatprep.subr.bf16.mxu0 %v2233_v4 }
 0x86f   : > { %2065 = vmatpush3.bf16.msra.mxu0 %v2333_v6 }
 0x870   : > { %2078 = vmatprep.subr.bf16.mxu0 %v2233_v4 }
 0x93d   : > { %v805_v32 = vpop.f32.mrb[12].mxu0 }
 0x93e   : > { %v811_v33 = vadd.f32 %v805_v32, %v2359_v16  ;;  %v2052_v34 = vpop.f32.mrb[13].mxu0 }
 0x93f   : > { %v808_v35 = vpop.f32.mrb[14].mxu0 }
 0x940   : > { %2185 = vtanh.f32 %v811_v33  ;;  %v2053_v36 = vpop.f32.mrb[15].mxu0  ;;  %v1953_v38 = vmul.f32 -1.442695, %v811_v33 }
 0x942   : > { %2187 = vpow2.f32 %v1953_v38 }
 0x94a   : > { %v2186_v37 = vpop.eup %2185 }
 0x94b   : > { %821 = vrot.lane.b32.xlu0 %v2186_v37, %s2236_s12 }
 0x94c   : > { %v2188_v39 = vpop.eup %2187 }
 0x94d   : > { %v815_v40 = vadd.f32 1.0, %v2188_v39 }
 0x94f   : > { %2189 = vrcp.f32 %v815_v40 }
 0x959   : > { %v2190_v41 = vpop.eup %2189 }
 0x95a   : > { %v819_v44 = vmul.f32 %v2190_v41, %v757_v13 }
 0x9bd   : > { %v822_v42 = vpop.permute.xlu0 %821 }
 0x9be   : > { %v824_v43 = vmul.f32 %v2190_v41, %v822_v42 }
 0x9c0   : > { %826 = vrot.lane.b32.xlu1 %v824_v43, %s2236_s12 }
 0xa32   : > { %v827_v46 = vpop.permute.xlu1 %826 }
 0xa33   : > { %v829_v16 = vadd.f32 %v827_v46, %v819_v44 }
 0xa35   : > { %2191 = vtanh.f32 %v829_v16 }
 0xa3f   : > { %v2192_v47 = vpop.eup %2191 }
 0xa40   : > { %832 = vrot.lane.b32.xlu0 %v2192_v47, %s2236_s12 }
 0xab2   : > { %v833_v48 = vpop.permute.xlu0 %832 }
 0xab3   : > { %v2419_v49 = vmul.f32 %v2190_v41, %v833_v48 }
 0xab5   : > { %v836_v50 = vpack.c.bf16 %v2419_v49, %v2419_v49 }
 0xab7   : > { %838 = vrot.lane.b32.xlu1 %v836_v50, %s2237_s15 }
 0xb29   : > { %v839_v51 = vpop.permute.xlu1 %838 }
 0xb2a   : > { %2059 = vmatmul.mubr.msk.bf16.vlgmr.msra.gmra.mrb[8].mxu1 %vm551_vm2, %v839_v51 }
 0xb2b   : > { %2071 = vmatpush3.bf16.msra.mxu1 %v2319_v3  ;;  %2074 = vmatprep.mubr.msk.bf16.mxu1 %vm2234_vm1, %v2233_v4 }
 0xb2c   : > { %2072 = vmatprep.subr.bf16.mxu1 %v2233_v4 }
 0xb2f   : > { %2073 = vmatpush3.bf16.msra.mxu1 %v2333_v6 }
 0xbfd   : > { %v877_v52 = vpop.f32.mrb[8].mxu1 }
 0xbfe   : > { %v883_v53 = vadd.f32 %v877_v52, %v2363_v22  ;;  %v2060_v54 = vpop.f32.mrb[9].mxu1 }
 0xbff   : > { %v880_v55 = vpop.f32.mrb[10].mxu1 }
 0xc00   : > { %2193 = vtanh.f32 %v883_v53  ;;  %v2061_v56 = vpop.f32.mrb[11].mxu1  ;;  %v1955_v58 = vmul.f32 -1.442695, %v883_v53 }
 0xc02   : > { %2195 = vpow2.f32 %v1955_v58 }
 0xc0a   : > { %v2194_v57 = vpop.eup %2193 }
 0xc0b   : > { %893 = vrot.lane.b32.xlu0 %v2194_v57, %s2236_s12 }
 0xc0c   : > { %v2196_v59 = vpop.eup %2195 }
 0xc0d   : > { %v887_v60 = vadd.f32 1.0, %v2196_v59 }
 0xc0f   : > { %2197 = vrcp.f32 %v887_v60 }
 0xc19   : > { %v2198_v61 = vpop.eup %2197 }
 0xc1a   : > { %v891_v0 = vmul.f32 %v2198_v61, %v829_v16 }
 0xc7d   : > { %v894_v62 = vpop.permute.xlu0 %893 }
 0xc7e   : > { %v896_v63 = vmul.f32 %v2198_v61, %v894_v62 }
 0xc80   : > { %898 = vrot.lane.b32.xlu1 %v896_v63, %s2236_s12 }
 0xcf2   : > { %v899_v2 = vpop.permute.xlu1 %898 }
 0xcf3   : > { %v901_v22 = vadd.f32 %v899_v2, %v891_v0 }
 0xcf5   : > { %2199 = vtanh.f32 %v901_v22 }
 0xcff   : > { %v2200_v5 = vpop.eup %2199 }
 0xd00   : > { %904 = vrot.lane.b32.xlu0 %v2200_v5, %s2236_s12 }
 0xd72   : > { %v905_v7 = vpop.permute.xlu0 %904 }
 0xd73   : > { %v2434_v8 = vmul.f32 %v2198_v61, %v905_v7 }
 0xd75   : > { %v908_v9 = vpack.c.bf16 %v2434_v8, %v2434_v8 }
 0xd77   : > { %910 = vrot.lane.b32.xlu1 %v908_v9, %s2237_s15  ;;  %v2145_v9 = vpack.i.bf16 %v2434_v8, %v2419_v49  ;;  %v1279_v8 = vlaneseq }
 0xde9   : > { %v911_v10 = vpop.permute.xlu1 %910 }
 0xdea   : > { %2067 = vmatmul.mubr.msk.bf16.vlgmr.msra.gmra.mrb[16].mxu0 %vm551_vm2, %v911_v10  ;;  %v2159_v10 = vld [vmem:[%s3162_s4] sm:$0xff]  }
 0xdeb   : > { %2079 = vmatpush3.bf16.msra.mxu0 %v2319_v3  ;;  %2082 = vmatprep.mubr.msk.bf16.mxu0 %vm2234_vm1, %v2233_v4 }
 0xdec   : > { %2080 = vmatprep.subr.bf16.mxu0 %v2233_v4  ;;  %2086 = vmatprep.subr.bf16.mxu1 %v2159_v10 }
 0xdef   : > { %2081 = vmatpush3.bf16.msra.mxu0 %v2333_v6 }
 0xebd   : > { %v949_v11 = vpop.f32.mrb[16].mxu0 }
 0xebe   : > { %v955_v12 = vadd.f32 %v949_v11, %v2367_v26  ;;  %v2068_v14 = vpop.f32.mrb[17].mxu0  ;;  %v2160_v11 = vld [vmem:[%s3162_s4 + $0x8] sm:$0xff]  }
 0xebf   : > { %v952_v15 = vpop.f32.mrb[18].mxu0 }
 0xec0   : > { %2201 = vtanh.f32 %v955_v12  ;;  %v2069_v17 = vpop.f32.mrb[19].mxu0  ;;  %v1957_v19 = vmul.f32 -1.442695, %v955_v12  ;;  %v2481_v15 = vand.u32 127, %v1279_v8 }
 0xec1   : > { %v1285_v17 = vshrl.u32 %v1279_v8, 7 }
 0xec2   : > { %2203 = vpow2.f32 %v1957_v19  ;;  %vm1282_vm3 = vcmp.eq.s32.totalorder %v2481_v15, 3 }
 0xec3   : > { %v1299_v19 = vsub.s32 1, %v1285_v17 }
 0xeca   : > { %v2202_v18 = vpop.eup %2201 }
 0xecb   : > { %965 = vrot.lane.b32.xlu0 %v2202_v18, %s2236_s12  ;;  %v1278_v18 = vld [vmem:[%s3164_s6] sm:$0x1f] }
 0xecc   : > { %v2204_v3 = vpop.eup %2203 }
 0xecd   : > { %v959_v21 = vadd.f32 1.0, %v2204_v3  ;;  %v2238_v3 = vmov -10000.0  }
 0xecf   : > { %2205 = vrcp.f32 %v959_v21  ;;  %v1312_v21 = vsub.s32 2, %v1285_v17 }
 0xed9   : > { %v2206_v23 = vpop.eup %2205 }
 0xeda   : > { %v963_v6 = vmul.f32 %v2206_v23, %v901_v22 }
 0xf3d   : > { %v966_v25 = vpop.permute.xlu0 %965 }
 0xf3e   : > { %v968_v4 = vmul.f32 %v2206_v23, %v966_v25  ;;  %v2487_v25 = vrot.slane %v1278_v18, %v1299_v19 }
 0xf40   : > { %970 = vrot.lane.b32.xlu1 %v968_v4, %s2236_s12 }
 0xfb2   : > { %v971_v13 = vpop.permute.xlu1 %970 }
 0xfb3   : > { %v973_v26 = vadd.f32 %v971_v13, %v963_v6 }
 0xfb5   : > { %2207 = vtanh.f32 %v973_v26 }
 0xfbf   : > { %v2208_v27 = vpop.eup %2207 }
 0xfc0   : > { %976 = vrot.lane.b32.xlu0 %v2208_v27, %s2236_s12 }
0x1032   : > { %v977_v28 = vpop.permute.xlu0 %976 }
0x1033   : > { %v2449_v30 = vmul.f32 %v2206_v23, %v977_v28  ;;  %v1338_v23 = vsub.s32 4, %v1285_v17 }
0x1035   : > { %v980_v31 = vpack.c.bf16 %v2449_v30, %v2449_v30  ;;  %v2140_v49 = vpack.i.bf16 %v2449_v30, %v2403_v29  ;;  %v2489_v29 = vrot.slane %v1278_v18, %v1312_v21  ;;  %v2494_v6 = vrot.slane %v1278_v18, %v1338_v23 }
0x1037   : > { %982 = vrot.lane.b32.xlu1 %v980_v31, %s2237_s15  ;;  %v1286_v31 = vsub.s32 0, %v1285_v17 }
0x10a9   : > { %v983_v32 = vpop.permute.xlu1 %982 }
0x10aa   : > { %2075 = vmatmul.mubr.msk.bf16.vlgmr.msra.gmra.mrb[12].mxu1 %vm551_vm2, %v983_v32  ;;  %v2508_v32 = vrot.slane %v1278_v18, %v1286_v31 }
0x10ab   : > { %2087 = vmatpush3.bf16.msra.mxu1 %v2159_v10 }
0x10ac   : > { %2088 = vmatprep.subr.bf16.mxu1 %v2160_v11 }
0x10af   : > { %2089 = vmatpush3.bf16.msra.mxu1 %v2160_v11 }
0x117d   : > { %v1021_v33 = vpop.f32.mrb[12].mxu1 }
0x117e   : > { %v1027_v34 = vadd.f32 %v1021_v33, %v2361_v20  ;;  %v2076_v35 = vpop.f32.mrb[13].mxu1  ;;  %v1325_v33 = vsub.s32 3, %v1285_v17 }
0x117f   : > { %v1024_v36 = vpop.f32.mrb[14].mxu1 }
0x1180   : > { %2209 = vtanh.f32 %v1027_v34  ;;  %v2077_v37 = vpop.f32.mrb[15].mxu1  ;;  %v1959_v39 = vmul.f32 -1.442695, %v1027_v34  ;;  %v2510_v34 = vrot.slane %v1278_v18, %v1325_v33 }
0x1182   : > { %2211 = vpow2.f32 %v1959_v39 }
0x118a   : > { %v2210_v38 = vpop.eup %2209 }
0x118b   : > { %1037 = vrot.lane.b32.xlu0 %v2210_v38, %s2236_s12 }
0x118c   : > { %v2212_v40 = vpop.eup %2211 }
0x118d   : > { %v1031_v41 = vadd.f32 1.0, %v2212_v40 }
0x118f   : > { %2213 = vrcp.f32 %v1031_v41 }
0x1199   : > { %v2214_v42 = vpop.eup %2213 }
0x119a   : > { %v1035_v46 = vmul.f32 %v2214_v42, %v973_v26 }
0x11fd   : > { %v1038_v43 = vpop.permute.xlu0 %1037 }
0x11fe   : > { %v1040_v44 = vmul.f32 %v2214_v42, %v1038_v43 }
0x1200   : > { %1042 = vrot.lane.b32.xlu1 %v1040_v44, %s2236_s12 }
0x1272   : > { %v1043_v16 = vpop.permute.xlu1 %1042 }
0x1273   : > { %v1045_v20 = vadd.f32 %v1043_v16, %v1035_v46 }
0x1275   : > { %2215 = vtanh.f32 %v1045_v20 }
0x127f   : > { %v2216_v47 = vpop.eup %2215 }
0x1280   : > { %1048 = vrot.lane.b32.xlu0 %v2216_v47, %s2236_s12 }
0x12f2   : > { %v1049_v48 = vpop.permute.xlu0 %1048 }
0x12f3   : > { %v1051_v50 = vmul.f32 %v2214_v42, %v1049_v48 }
0x12f5   : > { %v1052_v51 = vpack.c.bf16 %v1051_v50, %v1051_v50  ;;  %v2130_v7 = vpack.i.bf16 %v1051_v50, %v2387_v1 }
0x12f7   : > { %1054 = vrot.lane.b32.xlu1 %v1052_v51, %s2237_s15 }
0x1369   : > { %v1055_v52 = vpop.permute.xlu1 %1054 }
0x136a   : > { %2083 = vmatmul.mubr.msk.bf16.vlgmr.msra.gmra.mrb[20].mxu0 %vm551_vm2, %v1055_v52 }
0x143d   : > { %v1093_v53 = vpop.f32.mrb[20].mxu0 }
0x143e   : > { %v1099_v54 = vadd.f32 %v1093_v53, %v2365_v24  ;;  %v2084_v55 = vpop.f32.mrb[21].mxu0 }
0x143f   : > { %v1096_v56 = vpop.f32.mrb[22].mxu0 }
0x1440   : > { %2217 = vtanh.f32 %v1099_v54  ;;  %v2085_v57 = vpop.f32.mrb[23].mxu0  ;;  %v1961_v59 = vmul.f32 -1.442695, %v1099_v54 }
0x1442   : > { %2219 = vpow2.f32 %v1961_v59 }
0x144a   : > { %v2218_v58 = vpop.eup %2217 }
0x144b   : > { %1109 = vrot.lane.b32.xlu0 %v2218_v58, %s2236_s12 }
0x144c   : > { %v2220_v60 = vpop.eup %2219 }
0x144d   : > { %v1103_v61 = vadd.f32 1.0, %v2220_v60 }
0x144f   : > { %2221 = vrcp.f32 %v1103_v61 }
0x1459   : > { %v2222_v62 = vpop.eup %2221 }
0x145a   : > { %v1107_v2 = vmul.f32 %v2222_v62, %v1045_v20 }
0x14bd   : > { %v1110_v63 = vpop.permute.xlu0 %1109 }
0x14be   : > { %v1112_v0 = vmul.f32 %v2222_v62, %v1110_v63 }
0x14c0   : > { %1114 = vrot.lane.b32.xlu1 %v1112_v0, %s2236_s12 }
0x1532   : > { %v1115_v22 = vpop.permute.xlu1 %1114 }
0x1533   : > { %v1117_v24 = vadd.f32 %v1115_v22, %v1107_v2 }
0x1535   : > { %2223 = vtanh.f32 %v1117_v24 }
0x153f   : > { %v2224_v5 = vpop.eup %2223 }
0x1540   : > { %1120 = vrot.lane.b32.xlu0 %v2224_v5, %s2236_s12  ;;  %s392_s12 = scalar_lea.vmem %s3167_s9, %s1931_s29 }
0x1544   : > { %2131 = vrot.lane.b32.xlu0 %v2130_v7, %s2237_s15  ;;  %v1962_v7 = vld [vmem:[%s3163_s5] ss:$0 sm:$0xff] }
0x1548   : > { %2146 = vrot.lane.b32.xlu0 %v2145_v9, %s2237_s15 }
0x15b2   : > { %v1121_v1 = vpop.permute.xlu0 %1120 }
0x15b3   : > { %v1123_v12 = vmul.f32 %v2222_v62, %v1121_v1 }
0x15b5   : > { %v2135_v14 = vpack.i.bf16 %v1123_v12, %v2372_v45  ;;  %v1283_v45 = vsel %vm1282_vm3, 0.0, %v2238_v3 }
0x15b6   : > { %v2492_v4 = vadd.f32 %v2487_v25, %v1283_v45  ;;  %v2497_v13 = vadd.f32 %v2489_v29, %v1283_v45  ;;  %v2504_v28 = vadd.f32 %v2494_v6, %v1283_v45  ;;  %v2513_v35 = vadd.f32 %v2508_v32, %v1283_v45  ;;  %v2132_v39 = vpop.permute.xlu0 %2131 }
0x15b7   : > { %2136 = vrot.lane.b32.xlu1 %v2135_v14, %s2237_s15  ;;  %v2518_v37 = vadd.f32 %v2510_v34, %v1283_v45  ;;  %v2134_v40 = vunpack.i.h.bf16 %v2132_v39  ;;  %v2133_v41 = vunpack.i.l.bf16 %v2132_v39 }
0x15b8   : > { %v1302_v26 = vsel %vm1269_vm4, %v2492_v4, -inf  ;;  %v1315_v27 = vsel %vm1269_vm4, %v2497_v13, -inf  ;;  %v1341_v30 = vsel %vm1269_vm4, %v2504_v28, -inf  ;;  %v1289_v36 = vsel %vm1269_vm4, %v2513_v35, -inf }
0x15b9   : > { %1303 = vmax.xlane.f32.xlu0 %v1302_v26  ;;  %v1328_v38 = vsel %vm1269_vm4, %v2518_v37, -inf  ;;  %v1142_v16 = vsel %vm1132_vm5, %v2133_v41, %v2134_v40  ;;  %v1163_v61 = vsel %vm1132_vm5, %v2134_v40, %v2133_v41 }
0x15ba   : > { %v2147_v42 = vpop.permute.xlu0 %2146 }
0x15bb   : > { %2141 = vrot.lane.b32.xlu1 %v2140_v49, %s2237_s15  ;;  %v2149_v20 = vunpack.i.h.bf16 %v2147_v42  ;;  %v2148_v47 = vunpack.i.l.bf16 %v2147_v42 }
0x15bd   : > { %1316 = vmax.xlane.f32.xlu0 %v1315_v27  ;;  %v1160_v54 = vsel %vm1132_vm5, %v2148_v47, %v2149_v20  ;;  %v1161_v55 = vsel %vm1132_vm5, %v2149_v20, %v2148_v47 }
0x15c1   : > { %1342 = vmax.xlane.f32.xlu0 %v1341_v30 }
0x15df   : > { %1290 = vmax.xlane.f32.xlu1 %v1289_v36 }
0x15e3   : > { %1329 = vmax.xlane.f32.xlu1 %v1328_v38 }
0x1629   : > { %v2137_v43 = vpop.permute.xlu1 %2136 }
0x162a   : > { %v2139_v44 = vunpack.i.h.bf16 %v2137_v43  ;;  %v2138_v46 = vunpack.i.l.bf16 %v2137_v43 }
0x162c   : > { %v1133_v48 = vsel %vm1132_vm5, %v2138_v46, %v2139_v44  ;;  %v1164_v60 = vsel %vm1132_vm5, %v2139_v44, %v2138_v46 }
0x162d   : > { %v1165_v50 = vpack.c.bf16 %v1142_v16, %v1133_v48  ;;  %v2142_v51 = vpop.permute.xlu1 %2141  ;;  %v1168_v62 = vpack.c.bf16 %v1164_v60, %v1163_v61 }
0x162e   : > { %v2144_v52 = vunpack.i.h.bf16 %v2142_v51  ;;  %v2143_v53 = vunpack.i.l.bf16 %v2142_v51 }
0x162f   : > { %2090 = vmatprep.mubr.msk.bf16.mxu1 %vm551_vm2, %v1165_v50 }
0x1630   : > { %v1151_v56 = vsel %vm1132_vm5, %v2143_v53, %v2144_v52  ;;  %v1162_v57 = vsel %vm1132_vm5, %v2144_v52, %v2143_v53 }
0x1631   : > { %v1166_v58 = vpack.c.bf16 %v1160_v54, %v1151_v56  ;;  %v1167_v59 = vpack.c.bf16 %v1162_v57, %v1161_v55 }
0x1633   : > { %2091 = vmatmul.mubr.msk.bf16.vlgmr.msra.gmra.mrb[16].mxu1 %vm551_vm2, %v1166_v58 }
0x1634   : > { %2094 = vmatprep.mubr.msk.bf16.mxu1 %vm551_vm2, %v1167_v59 }
0x163b   : > { %2095 = vmatmul.mubr.msk.bf16.gmra.mrb[20].mxu1 %vm551_vm2, %v1168_v62 }
0x1646   : > { %v2534_v63 = vpop.xlane.xlu0 %1303 }
0x1647   : > { %vm1305_vm10 = vcmp.eq.f32.partialorder %v2492_v4, %v2534_v63 }
0x164a   : > { %v2541_v22 = vpop.xlane.xlu0 %1316 }
0x164b   : > { %vm1318_vm2 = vcmp.eq.f32.partialorder %v2497_v13, %v2541_v22 }
0x164e   : > { %v2553_v10 = vpop.xlane.xlu0 %1342 }
0x166c   : > { %v2536_v0 = vpop.xlane.xlu1 %1290 }
0x166d   : > { %v1357_v2 = vsel %vm1349_vm6, %v2536_v0, %v2534_v63  ;;  %vm1292_vm11 = vcmp.eq.f32.partialorder %v2513_v35, %v2536_v0 }
0x166e   : > { %v1358_v24 = vsel %vm1351_vm7, %v1357_v2, %v2541_v22 }
0x1670   : > { %v2545_v5 = vpop.xlane.xlu1 %1329 }
0x1671   : > { %v1359_v9 = vsel %vm1353_vm8, %v1358_v24, %v2545_v5 }
0x1672   : > { %v1360_v8 = vsel %vm1355_vm9, %v1359_v9, %v2553_v10 }
0x1706   : > { %v2092_v11 = vpop.f32.mrb[16].mxu1 }
0x1707   : > { %v2562_v1 = vadd.f32 %v2092_v11, %v1962_v7  ;;  %v1238_v12 = vpop.f32.mrb[17].mxu1 }
0x1708   : > { %v1239_v14 = vadd.f32 %v1962_v7, %v1238_v12  ;;  %v2093_v49 = vpop.f32.mrb[18].mxu1 }
0x1709   : > { %1272 = vst.msk [vmem:[%s2560_s28 + $0x10] sm:$0xff] %vm1269_vm4, %v2562_v1  ;;  %v2569_v17 = vadd.f32 %v2093_v49, %v1962_v7  ;;  %v1241_v18 = vpop.f32.mrb[19].mxu1 }
0x170a   : > { %1270 = vst.msk [vmem:[%s2560_s28] sm:$0xff] %vm1269_vm4, %v1239_v14  ;;  %v1361_v19 = vadd.f32 %v1360_v8, %v1239_v14  ;;  %v1242_v3 = vadd.f32 %v1962_v7, %v1241_v18 }
0x170b   : > { %1273 = vst.msk [vmem:[%s2560_s28 + $0x18] sm:$0xff] %vm1269_vm4, %v2569_v17 }
0x170c   : > { %1271 = vst.msk [vmem:[%s2560_s28 + $0x8] sm:$0xff] %vm1269_vm4, %v1242_v3  ;;  %v2579_v45 = vadd.f32 %v1361_v19, %v2487_v25  ;;  %v2582_v21 = vadd.f32 %v1361_v19, %v2508_v32  ;;  %v2589_v30 = vadd.f32 %v1361_v19, %v2510_v34  ;;  %v2592_v31 = vadd.f32 %v1361_v19, %v2489_v29 }
0x170d   : > { %v2613_v46 = vadd.f32 %v1361_v19, %v2494_v6 }
0x170e   : > { %v2096_v23 = vpop.f32.mrb[20].mxu1  ;;  %v1372_v26 = vsel %vm1269_vm4, %v2579_v45, -inf  ;;  %v1363_v27 = vsel %vm1269_vm4, %v2582_v21, -inf  ;;  %3192 = vst [vmem:[#allocation2_spill] sm:$0xff] %v2589_v30  ;;  %3193 = vst [vmem:[#allocation3_spill] sm:$0xff] %v2592_v31  ;;  %v1390_v43 = vsel %vm1269_vm4, %v2589_v30, -inf }
0x170f   : > { %v2594_v33 = vadd.f32 %v2096_v23, %v1962_v7  ;;  %v1254_v36 = vpop.f32.mrb[21].mxu1  ;;  %1373 = vmax.xlane.f32.xlu0 %v1372_v26  ;;  %1364 = vmax.xlane.f32.xlu1 %v1363_v27  ;;  %v1381_v44 = vsel %vm1269_vm4, %v2592_v31, -inf  ;;  %3194 = vst [vmem:[#allocation4_spill] sm:$0xff] %v2613_v46  ;;  %v1399_v16 = vsel %vm1269_vm4, %v2613_v46, -inf }
0x1710   : > { %v2596_v38 = vadd.f32 %v1962_v7, %v1254_v36  ;;  %v2097_v39 = vpop.f32.mrb[22].mxu1 }
0x1711   : > { %1276 = vst.msk [vmem:[%s2560_s28 + $0x30] sm:$0xff] %vm1269_vm4, %v2594_v33  ;;  %v2601_v40 = vadd.f32 %v2097_v39, %v1962_v7  ;;  %v1257_v41 = vpop.f32.mrb[23].mxu1 }
0x1712   : > { %1274 = vst.msk [vmem:[%s2560_s28 + $0x20] sm:$0xff] %vm1269_vm4, %v2596_v38  ;;  %v2606_v42 = vadd.f32 %v1962_v7, %v1257_v41 }
0x1713   : > { %1277 = vst.msk [vmem:[%s2560_s28 + $0x38] sm:$0xff] %vm1269_vm4, %v2601_v40  ;;  %1391 = vmax.xlane.f32.xlu0 %v1390_v43  ;;  %1382 = vmax.xlane.f32.xlu1 %v1381_v44 }
0x1714   : > { %1275 = vst.msk [vmem:[%s2560_s28 + $0x28] sm:$0xff] %vm1269_vm4, %v2606_v42 }
0x1717   : > { %1400 = vmax.xlane.f32.xlu1 %v1399_v16 }
0x179c   : > { %v2623_v20 = vpop.xlane.xlu0 %1373  ;;  %v2625_v47 = vpop.xlane.xlu1 %1364 }
0x179d   : > { %v1411_v48 = vsel %vm1349_vm6, %v2625_v47, %v2623_v20  ;;  %vm1366_vm12 = vcmp.eq.f32.partialorder %v2582_v21, %v2625_v47 }
0x17a0   : > { %v2630_v50 = vpop.xlane.xlu1 %1382  ;;  %v2632_v51 = vpop.xlane.xlu0 %1391 }
0x17a1   : > { %3195 = vst [vmem:[#allocation5_spill] sm:$0xff] %v2630_v50  ;;  %3196 = vst [vmem:[#allocation6_spill] sm:$0xff] %v2632_v51  ;;  %v1412_v52 = vsel %vm1351_vm7, %v1411_v48, %v2630_v50 }
0x17a2   : > { %v1413_v53 = vsel %vm1353_vm8, %v1412_v52, %v2632_v51 }
0x17a4   : > { %v2638_v54 = vpop.xlane.xlu1 %1400 }
0x17a5   : > { %3197 = vst [vmem:[#allocation7_spill] sm:$0xff] %v2638_v54  ;;  %v1414_v55 = vsel %vm1355_vm9, %v1413_v53, %v2638_v54 }
0x17a6   : > { %v1415_v56 = vadd.f32 %v1414_v55, %v1242_v3 }
0x17a8   : > { %v2643_v57 = vadd.f32 %v1415_v56, %v2487_v25  ;;  %v2646_v58 = vadd.f32 %v1415_v56, %v2508_v32  ;;  %v2653_v61 = vadd.f32 %v1415_v56, %v2510_v34  ;;  %v2656_v62 = vadd.f32 %v1415_v56, %v2489_v29 }
0x17a9   : > { %v2663_v7 = vadd.f32 %v1415_v56, %v2494_v6 }
0x17aa   : > { %v1426_v59 = vsel %vm1269_vm4, %v2643_v57, -inf  ;;  %v1417_v60 = vsel %vm1269_vm4, %v2646_v58, -inf  ;;  %v1444_v2 = vsel %vm1269_vm4, %v2653_v61, -inf  ;;  %v1435_v24 = vsel %vm1269_vm4, %v2656_v62, -inf }
0x17ab   : > { %1427 = vmax.xlane.f32.xlu1 %v1426_v59  ;;  %1418 = vmax.xlane.f32.xlu0 %v1417_v60  ;;  %3198 = vst [vmem:[#allocation8_spill] sm:$0xff] %v2663_v7  ;;  %v1453_v9 = vsel %vm1269_vm4, %v2663_v7, -inf }
0x17af   : > { %1445 = vmax.xlane.f32.xlu1 %v1444_v2  ;;  %1436 = vmax.xlane.f32.xlu0 %v1435_v24 }
0x17b3   : > { %1454 = vmax.xlane.f32.xlu0 %v1453_v9 }
0x1838   : > { %v2667_v11 = vpop.xlane.xlu1 %1427  ;;  %v2669_v12 = vpop.xlane.xlu0 %1418 }
0x1839   : > { %v1465_v14 = vsel %vm1349_vm6, %v2669_v12, %v2667_v11  ;;  %vm1420_vm13 = vcmp.eq.f32.partialorder %v2646_v58, %v2669_v12 }
0x183c   : > { %v2674_v49 = vpop.xlane.xlu0 %1436  ;;  %v2676_v8 = vpop.xlane.xlu1 %1445 }
0x183d   : > { %v1466_v18 = vsel %vm1351_vm7, %v1465_v14, %v2674_v49  ;;  %vm1438_vm5 = vcmp.eq.f32.partialorder %v2656_v62, %v2674_v49 }
0x183e   : > { %v1467_v19 = vsel %vm1353_vm8, %v1466_v18, %v2676_v8 }
0x1840   : > { %v2682_v3 = vpop.xlane.xlu0 %1454 }
0x1841   : > { %3199 = vst [vmem:[#allocation9_spill] sm:$0xff] %v2682_v3  ;;  %v1468_v23 = vsel %vm1355_vm9, %v1467_v19, %v2682_v3 }
0x1842   : > { %v1469_v26 = vadd.f32 %v1468_v23, %v2562_v1 }
0x1844   : > { %v2688_v27 = vadd.f32 %v1469_v26, %v2487_v25  ;;  %v2691_v36 = vadd.f32 %v1469_v26, %v2508_v32  ;;  %v2698_v43 = vadd.f32 %v1469_v26, %v2510_v34  ;;  %v2701_v44 = vadd.f32 %v1469_v26, %v2489_v29 }
0x1845   : > { %v2708_v48 = vadd.f32 %v1469_v26, %v2494_v6 }
0x1846   : > { %v1480_v39 = vsel %vm1269_vm4, %v2688_v27, -inf  ;;  %v1471_v41 = vsel %vm1269_vm4, %v2691_v36, -inf  ;;  %3200 = vst [vmem:[#allocation10_spill] sm:$0xff] %v2698_v43  ;;  %3201 = vst [vmem:[#allocation11_spill] sm:$0xff] %v2701_v44  ;;  %v1498_v1 = vsel %vm1269_vm4, %v2698_v43, -inf  ;;  %v1489_v16 = vsel %vm1269_vm4, %v2701_v44, -inf }
0x1847   : > { %1481 = vmax.xlane.f32.xlu0 %v1480_v39  ;;  %1472 = vmax.xlane.f32.xlu1 %v1471_v41  ;;  %3202 = vst [vmem:[#allocation12_spill] sm:$0xff] %v2708_v48  ;;  %v1507_v52 = vsel %vm1269_vm4, %v2708_v48, -inf }
0x184b   : > { %1499 = vmax.xlane.f32.xlu0 %v1498_v1  ;;  %1490 = vmax.xlane.f32.xlu1 %v1489_v16 }
0x184f   : > { %1508 = vmax.xlane.f32.xlu1 %v1507_v52 }
0x18d4   : > { %v2712_v53 = vpop.xlane.xlu0 %1481  ;;  %v2714_v55 = vpop.xlane.xlu1 %1472 }
0x18d5   : > { %v1519_v56 = vsel %vm1349_vm6, %v2714_v55, %v2712_v53  ;;  %vm1474_vm14 = vcmp.eq.f32.partialorder %v2691_v36, %v2714_v55 }
0x18d8   : > { %v2719_v59 = vpop.xlane.xlu1 %1490  ;;  %v2721_v60 = vpop.xlane.xlu0 %1499 }
0x18d9   : > { %3203 = vst [vmem:[#allocation13_spill] sm:$0xff] %v2719_v59  ;;  %3204 = vst [vmem:[#allocation14_spill] sm:$0xff] %v2721_v60  ;;  %v1520_v2 = vsel %vm1351_vm7, %v1519_v56, %v2719_v59 }
0x18da   : > { %v1521_v24 = vsel %vm1353_vm8, %v1520_v2, %v2721_v60 }
0x18dc   : > { %v2727_v9 = vpop.xlane.xlu1 %1508 }
0x18dd   : > { %3205 = vst [vmem:[#allocation15_spill] sm:$0xff] %v2727_v9  ;;  %v1522_v14 = vsel %vm1355_vm9, %v1521_v24, %v2727_v9 }
0x18de   : > { %v1523_v18 = vadd.f32 %v1522_v14, %v2569_v17 }
0x18e0   : > { %v2733_v19 = vadd.f32 %v1523_v18, %v2487_v25  ;;  %v2736_v23 = vadd.f32 %v1523_v18, %v2508_v32  ;;  %v2743_v41 = vadd.f32 %v1523_v18, %v2510_v34  ;;  %v2746_v1 = vadd.f32 %v1523_v18, %v2489_v29 }
0x18e1   : > { %v2753_v52 = vadd.f32 %v1523_v18, %v2494_v6 }
0x18e2   : > { %v1534_v26 = vsel %vm1269_vm4, %v2733_v19, -inf  ;;  %v1525_v39 = vsel %vm1269_vm4, %v2736_v23, -inf  ;;  %v1552_v17 = vsel %vm1269_vm4, %v2743_v41, -inf  ;;  %v1543_v16 = vsel %vm1269_vm4, %v2746_v1, -inf }
0x18e3   : > { %1535 = vmax.xlane.f32.xlu1 %v1534_v26  ;;  %1526 = vmax.xlane.f32.xlu0 %v1525_v39  ;;  %3206 = vst [vmem:[#allocation16_spill] sm:$0xff] %v2753_v52  ;;  %v1561_v56 = vsel %vm1269_vm4, %v2753_v52, -inf }
0x18e7   : > { %1553 = vmax.xlane.f32.xlu1 %v1552_v17  ;;  %1544 = vmax.xlane.f32.xlu0 %v1543_v16 }
0x18eb   : > { %1562 = vmax.xlane.f32.xlu0 %v1561_v56 }
0x1970   : > { %v2757_v2 = vpop.xlane.xlu1 %1535  ;;  %v2759_v24 = vpop.xlane.xlu0 %1526 }
0x1971   : > { %v1573_v14 = vsel %vm1349_vm6, %v2759_v24, %v2757_v2  ;;  %vm1528_vm15 = vcmp.eq.f32.partialorder %v2736_v23, %v2759_v24 }
0x1974   : > { %v2764_v26 = vpop.xlane.xlu0 %1544  ;;  %v2766_v39 = vpop.xlane.xlu1 %1553 }
0x1975   : > { %v1574_v18 = vsel %vm1351_vm7, %v1573_v14, %v2764_v26 }
0x1976   : > { %v1575_v17 = vsel %vm1353_vm8, %v1574_v18, %v2766_v39 }
0x1978   : > { %v2772_v16 = vpop.xlane.xlu0 %1562 }
0x1979   : > { %3207 = vst [vmem:[#allocation17_spill] sm:$0xff] %v2772_v16  ;;  %v1576_v56 = vsel %vm1355_vm9, %v1575_v17, %v2772_v16 }
0x197a   : > { %v1577_v48 = vadd.f32 %v1576_v56, %v2596_v38 }
0x197c   : > { %v2778_v9 = vadd.f32 %v1577_v48, %v2487_v25  ;;  %v2781_v46 = vadd.f32 %v1577_v48, %v2508_v32  ;;  %v2788_v18 = vadd.f32 %v1577_v48, %v2510_v34  ;;  %v2791_v43 = vadd.f32 %v1577_v48, %v2489_v29 }
0x197d   : > { %v2798_v56 = vadd.f32 %v1577_v48, %v2494_v6 }
0x197e   : > { %v1588_v54 = vsel %vm1269_vm4, %v2778_v9, -inf  ;;  %v1579_v14 = vsel %vm1269_vm4, %v2781_v46, -inf  ;;  %3208 = vst [vmem:[#allocation18_spill] sm:$0xff] %v2788_v18  ;;  %3209 = vst [vmem:[#allocation19_spill] sm:$0xff] %v2791_v43  ;;  %v1606_v38 = vsel %vm1269_vm4, %v2788_v18, -inf  ;;  %v1597_v17 = vsel %vm1269_vm4, %v2791_v43, -inf }
0x197f   : > { %1589 = vmax.xlane.f32.xlu0 %v1588_v54  ;;  %1580 = vmax.xlane.f32.xlu1 %v1579_v14  ;;  %3210 = vst [vmem:[#allocation20_spill] sm:$0xff] %v2798_v56  ;;  %v1615_v60 = vsel %vm1269_vm4, %v2798_v56, -inf }
0x1983   : > { %1607 = vmax.xlane.f32.xlu0 %v1606_v38  ;;  %1598 = vmax.xlane.f32.xlu1 %v1597_v17 }
0x1987   : > { %1616 = vmax.xlane.f32.xlu1 %v1615_v60 }
0x1a0c   : > { %v2802_v30 = vpop.xlane.xlu0 %1589  ;;  %v2804_v51 = vpop.xlane.xlu1 %1580 }
0x1a0d   : > { %v1627_v54 = vsel %vm1349_vm6, %v2804_v51, %v2802_v30  ;;  %vm1582_vm0 = vcmp.eq.f32.partialorder %v2781_v46, %v2804_v51 }
0x1a10   : > { %v2809_v14 = vpop.xlane.xlu1 %1598  ;;  %v2811_v18 = vpop.xlane.xlu0 %1607 }
0x1a11   : > { %3211 = vst [vmem:[#allocation21_spill] sm:$0xff] %v2809_v14  ;;  %3212 = vst [vmem:[#allocation22_spill] sm:$0xff] %v2811_v18  ;;  %v1628_v48 = vsel %vm1351_vm7, %v1627_v54, %v2809_v14 }
0x1a12   : > { %v1629_v38 = vsel %vm1353_vm8, %v1628_v48, %v2811_v18 }
0x1a14   : > { %v2817_v17 = vpop.xlane.xlu1 %1616 }
0x1a15   : > { %3213 = vst [vmem:[#allocation23_spill] sm:$0xff] %v2817_v17  ;;  %v1630_v60 = vsel %vm1355_vm9, %v1629_v38, %v2817_v17 }
0x1a16   : > { %v1631_v56 = vadd.f32 %v1630_v60, %v2606_v42 }
0x1a18   : > { %v2823_v43 = vadd.f32 %v1631_v56, %v2487_v25  ;;  %v2826_v44 = vadd.f32 %v1631_v56, %v2508_v32  ;;  %v2833_v48 = vadd.f32 %v1631_v56, %v2510_v34  ;;  %v2836_v18 = vadd.f32 %v1631_v56, %v2489_v29 }
0x1a19   : > { %v2843_v60 = vadd.f32 %v1631_v56, %v2494_v6 }
0x1a1a   : > { %v1642_v59 = vsel %vm1269_vm4, %v2823_v43, -inf  ;;  %v1633_v54 = vsel %vm1269_vm4, %v2826_v44, -inf  ;;  %v1660_v42 = vsel %vm1269_vm4, %v2833_v48, -inf  ;;  %v1651_v38 = vsel %vm1269_vm4, %v2836_v18, -inf }
0x1a1b   : > { %1643 = vmax.xlane.f32.xlu1 %v1642_v59  ;;  %1634 = vmax.xlane.f32.xlu0 %v1633_v54  ;;  %3214 = vst [vmem:[#allocation24_spill] sm:$0xff] %v2843_v60  ;;  %v1669_v17 = vsel %vm1269_vm4, %v2843_v60, -inf }
0x1a1f   : > { %1661 = vmax.xlane.f32.xlu1 %v1660_v42  ;;  %1652 = vmax.xlane.f32.xlu0 %v1651_v38 }
0x1a23   : > { %1670 = vmax.xlane.f32.xlu0 %v1669_v17 }
0x1aa8   : > { %v2847_v14 = vpop.xlane.xlu1 %1643  ;;  %v1635_v52 = vpop.xlane.xlu0 %1634 }
0x1aa9   : > { %v1681_v59 = vsel %vm1349_vm6, %v1635_v52, %v2847_v14  ;;  %vm1636_vm1 = vcmp.eq.f32.partialorder %v2826_v44, %v1635_v52 }
0x1aac   : > { %v2851_v54 = vpop.xlane.xlu0 %1652  ;;  %v2853_v16 = vpop.xlane.xlu1 %1661 }
0x1aad   : > { %v1682_v56 = vsel %vm1351_vm7, %v1681_v59, %v2851_v54 }
0x1aae   : > { %v1683_v42 = vsel %vm1353_vm8, %v1682_v56, %v2853_v16 }
0x1ab0   : > { %v2859_v38 = vpop.xlane.xlu0 %1670 }
0x1ab1   : > { %v1684_v17 = vsel %vm1355_vm9, %v1683_v42, %v2859_v38  ;;  %v2878_v42 = vcvt.s32.f32 %v2481_v15 }
0x1ab2   : > { %v1685_v60 = vadd.f32 %v1684_v17, %v2594_v33 }
0x1ab3   : > { %v1293_v63 = vsel %vm1292_vm11, %v2878_v42, 5.0  ;;  %v1421_v0 = vsel %vm1420_vm13, %v2878_v42, 5.0  ;;  %v1475_v21 = vsel %vm1474_vm14, %v2878_v42, 5.0  ;;  %v1529_v58 = vsel %vm1528_vm15, %v2878_v42, 5.0 }
0x1ab4   : > { %v2865_v31 = vadd.f32 %v1685_v60, %v2487_v25  ;;  %v1686_v50 = vadd.f32 %v1685_v60, %v2508_v32  ;;  %v2872_v3 = vadd.f32 %v1685_v60, %v2510_v34  ;;  %v2875_v56 = vadd.f32 %v1685_v60, %v2489_v29 }
0x1ab5   : > { %v2887_v34 = vadd.f32 %v1685_v60, %v2494_v6  ;;  %v1306_v29 = vsel %vm1305_vm10, %v2878_v42, 5.0  ;;  %v1294_v33 = vsel %vm1269_vm4, %v1293_v63, inf  ;;  %v1422_v60 = vsel %vm1269_vm4, %v1421_v0, inf  ;;  %v3218_v0 = vld [vmem:[#allocation3_spill] sm:$0xff] }
0x1ab6   : > { %v1696_v7 = vsel %vm1269_vm4, %v2865_v31, -inf  ;;  %v1687_v59 = vsel %vm1269_vm4, %v1686_v50, -inf  ;;  %v1714_v25 = vsel %vm1269_vm4, %v2872_v3, -inf  ;;  %v1705_v32 = vsel %vm1269_vm4, %v2875_v56, -inf }
0x1ab7   : > { %1697 = vmax.xlane.f32.xlu0 %v1696_v7  ;;  %1688 = vmax.xlane.f32.xlu1 %v1687_v59  ;;  %v1307_v15 = vsel %vm1269_vm4, %v1306_v29, inf  ;;  %v1723_v4 = vsel %vm1269_vm4, %v2887_v34, -inf  ;;  %v1367_v7 = vsel %vm1366_vm12, %v2878_v42, 5.0  ;;  %v1476_v47 = vsel %vm1269_vm4, %v1475_v21, inf  ;;  %v3220_v21 = vld [vmem:[#allocation16_spill] sm:$0xff] }
0x1ab8   : > { %v1368_v35 = vsel %vm1269_vm4, %v1367_v7, inf  ;;  %v1530_v12 = vsel %vm1269_vm4, %v1529_v58, inf  ;;  %v1583_v36 = vsel %vm1582_vm0, %v2878_v42, 5.0  ;;  %v1637_v23 = vsel %vm1636_vm1, %v2878_v42, 5.0 }
0x1ab9   : > { %v1584_v55 = vsel %vm1269_vm4, %v1583_v36, inf  ;;  %v1638_v24 = vsel %vm1269_vm4, %v1637_v23, inf  ;;  %vm1546_vm10 = vcmp.eq.f32.partialorder %v2746_v1, %v2764_v26  ;;  %vm1375_vm11 = vcmp.eq.f32.partialorder %v2579_v45, %v2623_v20  ;;  %v3221_v36 = vld [vmem:[#allocation13_spill] sm:$0xff] }
0x1aba   : > { %vm1654_vm12 = vcmp.eq.f32.partialorder %v2836_v18, %v2851_v54  ;;  %v1376_v26 = vsel %vm1375_vm11, %v2878_v42, 5.0  ;;  %vm1429_vm13 = vcmp.eq.f32.partialorder %v2643_v57, %v2667_v11  ;;  %vm1331_vm14 = vcmp.eq.f32.partialorder %v2518_v37, %v2545_v5 }
0x1abb   : > { %1715 = vmax.xlane.f32.xlu0 %v1714_v25  ;;  %1706 = vmax.xlane.f32.xlu1 %v1705_v32  ;;  %v1319_v25 = vsel %vm1318_vm2, %v2878_v42, 5.0  ;;  %v1377_v45 = vsel %vm1269_vm4, %v1376_v26, inf  ;;  %v1430_v18 = vsel %vm1429_vm13, %v2878_v42, 5.0  ;;  %vm1483_vm15 = vcmp.eq.f32.partialorder %v2688_v27, %v2712_v53 }
0x1abc   : > { %v1320_v22 = vsel %vm1269_vm4, %v1319_v25, inf  ;;  %v1332_v54 = vsel %vm1331_vm14, %v2878_v42, 5.0  ;;  %vm1447_vm0 = vcmp.eq.f32.partialorder %v2653_v61, %v2676_v8  ;;  %v1431_v57 = vsel %vm1269_vm4, %v1430_v18, inf }
0x1abd   : > { %v1333_v37 = vsel %vm1269_vm4, %v1332_v54, inf  ;;  %v1484_v5 = vsel %vm1483_vm15, %v2878_v42, 5.0  ;;  %vm1537_vm1 = vcmp.eq.f32.partialorder %v2733_v19, %v2757_v2  ;;  %v1448_v11 = vsel %vm1447_vm0, %v2878_v42, 5.0 }
0x1abe   : > { %vm1555_vm2 = vcmp.eq.f32.partialorder %v2743_v41, %v2766_v39  ;;  %v1485_v27 = vsel %vm1269_vm4, %v1484_v5, inf  ;;  %v1449_v61 = vsel %vm1269_vm4, %v1448_v11, inf  ;;  %v1538_v8 = vsel %vm1537_vm1, %v2878_v42, 5.0 }
0x1abf   : > { %1308 = vmin.xlane.f32.xlu0 %v1307_v15  ;;  %1724 = vmax.xlane.f32.xlu1 %v1723_v4  ;;  %v1439_v15 = vsel %vm1438_vm5, %v2878_v42, 5.0  ;;  %v1556_v53 = vsel %vm1555_vm2, %v2878_v42, 5.0  ;;  %vm1663_vm5 = vcmp.eq.f32.partialorder %v2833_v48, %v2853_v16  ;;  %v1539_v19 = vsel %vm1269_vm4, %v1538_v8, inf }
0x1ac0   : > { %v1440_v4 = vsel %vm1269_vm4, %v1439_v15, inf  ;;  %v1557_v41 = vsel %vm1269_vm4, %v1556_v53, inf  ;;  %v1664_v39 = vsel %vm1663_vm5, %v2878_v42, 5.0  ;;  %vm1344_vm11 = vcmp.eq.f32.partialorder %v2504_v28, %v2553_v10  ;;  %v3237_v53 = vld [vmem:[#allocation20_spill] sm:$0xff] }
0x1ac1   : > { %v1345_v48 = vsel %vm1344_vm11, %v2878_v42, 5.0 }
0x1ac2   : > { %v1346_v28 = vsel %vm1269_vm4, %v1345_v48, inf }
0x1ac3   : > { %1295 = vmin.xlane.f32.xlu1 %v1294_v33  ;;  %v1547_v33 = vsel %vm1546_vm10, %v2878_v42, 5.0  ;;  %vm1645_vm10 = vcmp.eq.f32.partialorder %v2823_v43, %v2847_v14  ;;  %v3215_v43 = vld [vmem:[#allocation9_spill] sm:$0xff]  ;;  %v3216_v14 = vld [vmem:[#allocation8_spill] sm:$0xff] }
0x1ac4   : > { %v1646_v16 = vsel %vm1645_vm10, %v2878_v42, 5.0  ;;  %vm1456_vm13 = vcmp.eq.f32.partialorder %v3216_v14, %v3215_v43 }
0x1ac5   : > { %v1647_v7 = vsel %vm1269_vm4, %v1646_v16, inf }
0x1ac7   : > { %1369 = vmin.xlane.f32.xlu1 %v1368_v35  ;;  %v3217_v35 = vld [vmem:[#allocation5_spill] sm:$0xff] }
0x1ac8   : > { %vm1384_vm14 = vcmp.eq.f32.partialorder %v3218_v0, %v3217_v35 }
0x1acb   : > { %1423 = vmin.xlane.f32.xlu1 %v1422_v60  ;;  %v1457_v60 = vsel %vm1456_vm13, %v2878_v42, 5.0 }
0x1acc   : > { %v1458_v58 = vsel %vm1269_vm4, %v1457_v60, inf }
0x1acf   : > { %1477 = vmin.xlane.f32.xlu1 %v1476_v47 }
0x1ad3   : > { %1531 = vmin.xlane.f32.xlu1 %v1530_v12  ;;  %v1385_v12 = vsel %vm1384_vm14, %v2878_v42, 5.0 }
0x1ad7   : > { %1585 = vmin.xlane.f32.xlu1 %v1584_v55  ;;  %v3222_v55 = vld [vmem:[#allocation11_spill] sm:$0xff] }
0x1ad8   : > { %vm1492_vm0 = vcmp.eq.f32.partialorder %v3222_v55, %v3221_v36 }
0x1adb   : > { %1639 = vmin.xlane.f32.xlu1 %v1638_v24  ;;  %v3223_v24 = vld [vmem:[#allocation24_spill] sm:$0xff] }
0x1adc   : > { %vm1672_vm1 = vcmp.eq.f32.partialorder %v3223_v24, %v2859_v38 }
0x1add   : > { %v1673_v25 = vsel %vm1672_vm1, %v2878_v42, 5.0 }
0x1b44   : > { %v2920_v17 = vpop.xlane.xlu0 %1697  ;;  %v1689_v59 = vpop.xlane.xlu1 %1688 }
0x1b45   : > { %vm1690_vm3 = vcmp.eq.f32.partialorder %v1686_v50, %v1689_v59  ;;  %v1735_v44 = vsel %vm1349_vm6, %v1689_v59, %v2920_v17 }
0x1b46   : > { %v1691_v46 = vsel %vm1690_vm3, %v2878_v42, 5.0  ;;  %vm1591_vm3 = vcmp.eq.f32.partialorder %v2778_v9, %v2802_v30  ;;  %v1665_v9 = vsel %vm1269_vm4, %v1664_v39, inf }
0x1b47   : > { %v1692_v51 = vsel %vm1269_vm4, %v1691_v46, inf  ;;  %v1592_v2 = vsel %vm1591_vm3, %v2878_v42, 5.0  ;;  %v1493_v46 = vsel %vm1492_vm0, %v2878_v42, 5.0 }
0x1b48   : > { %1693 = vmin.xlane.f32.xlu1 %v1692_v51  ;;  %v2928_v52 = vpop.xlane.xlu1 %1706  ;;  %v2933_v32 = vpop.xlane.xlu0 %1715  ;;  %v1593_v30 = vsel %vm1269_vm4, %v1592_v2, inf  ;;  %v3224_v51 = vld [vmem:[#allocation21_spill] sm:$0xff] }
0x1b49   : > { %v1736_v13 = vsel %vm1351_vm7, %v1735_v44, %v2928_v52  ;;  %v3225_v44 = vld [vmem:[#allocation19_spill] sm:$0xff]  ;;  %vm1708_vm3 = vcmp.eq.f32.partialorder %v2875_v56, %v2928_v52  ;;  %v3230_v52 = vld [vmem:[#allocation22_spill] sm:$0xff] }
0x1b4a   : > { %v1737_v50 = vsel %vm1353_vm8, %v1736_v13, %v2933_v32  ;;  %vm1600_vm2 = vcmp.eq.f32.partialorder %v3225_v44, %v3224_v51  ;;  %v1494_v13 = vsel %vm1269_vm4, %v1493_v46, inf  ;;  %v1709_v15 = vsel %vm1708_vm3, %v2878_v42, 5.0 }
0x1b4b   : > { %v1601_v38 = vsel %vm1600_vm2, %v2878_v42, 5.0 }
0x1b4c   : > { %1321 = vmin.xlane.f32.xlu1 %v1320_v22  ;;  %v2940_v29 = vpop.xlane.xlu1 %1724  ;;  %v1674_v22 = vsel %vm1269_vm4, %v1673_v25, inf }
0x1b4d   : > { %v1738_v62 = vsel %vm1355_vm9, %v1737_v50, %v2940_v29  ;;  %v1602_v50 = vsel %vm1269_vm4, %v1601_v38, inf  ;;  %vm1726_vm0 = vcmp.eq.f32.partialorder %v2887_v34, %v2940_v29 }
0x1b4e   : > { %v1739_v49 = vadd.f32 %v1738_v62, %v2601_v40  ;;  %v1548_v40 = vsel %vm1269_vm4, %v1547_v33, inf  ;;  %v3226_v62 = vld [vmem:[#allocation6_spill] sm:$0xff]  ;;  %v1727_v39 = vsel %vm1726_vm0, %v2878_v42, 5.0 }
0x1b50   : > { %1441 = vmin.xlane.f32.xlu1 %v1440_v4  ;;  %v2952_v63 = vadd.f32 %v1739_v49, %v2494_v6  ;;  %v1655_v6 = vsel %vm1654_vm12, %v2878_v42, 5.0  ;;  %vm1699_vm12 = vcmp.eq.f32.partialorder %v2865_v31, %v2920_v17  ;;  %v3219_v31 = vld [vmem:[#allocation17_spill] sm:$0xff]  ;;  %v1386_v17 = vsel %vm1269_vm4, %v1385_v12, inf  ;;  %v3227_v49 = vld [vmem:[#allocation2_spill] sm:$0xff] }
0x1b51   : > { %v1656_v20 = vsel %vm1269_vm4, %v1655_v6, inf  ;;  %v1700_v10 = vsel %vm1699_vm12, %v2878_v42, 5.0  ;;  %vm1564_vm15 = vcmp.eq.f32.partialorder %v3220_v21, %v3219_v31  ;;  %vm1393_vm5 = vcmp.eq.f32.partialorder %v3227_v49, %v3226_v62  ;;  %v3231_v6 = vld [vmem:[#allocation18_spill] sm:$0xff] }
0x1b52   : > { %v1757_v1 = vsel %vm1269_vm4, %v2952_v63, -inf  ;;  %v1701_v47 = vsel %vm1269_vm4, %v1700_v10, inf  ;;  %v1565_v23 = vsel %vm1564_vm15, %v2878_v42, 5.0  ;;  %v1710_v4 = vsel %vm1269_vm4, %v1709_v15, inf  ;;  %v1309_v10 = vpop.xlane.xlu0 %1308 }
0x1b53   : > { %1758 = vmax.xlane.f32.xlu0 %v1757_v1  ;;  %v1566_v59 = vsel %vm1269_vm4, %v1565_v23, inf  ;;  %v1394_v33 = vsel %vm1393_vm5, %v2878_v42, 5.0  ;;  %v3228_v1 = vld [vmem:[#allocation14_spill] sm:$0xff]  ;;  %vm1609_vm11 = vcmp.eq.f32.partialorder %v3231_v6, %v3230_v52  ;;  %vm1717_vm12 = vcmp.eq.f32.partialorder %v2872_v3, %v2933_v32  ;;  %v3236_v32 = vld [vmem:[#allocation23_spill] sm:$0xff] }
0x1b54   : > { %1549 = vmin.xlane.f32.xlu1 %v1548_v40  ;;  %v3229_v40 = vld [vmem:[#allocation10_spill] sm:$0xff]  ;;  %v1395_v26 = vsel %vm1269_vm4, %v1394_v33, inf  ;;  %v1718_v54 = vsel %vm1717_vm12, %v2878_v42, 5.0  ;;  %vm1618_vm15 = vcmp.eq.f32.partialorder %v3237_v53, %v3236_v32 }
0x1b55   : > { %vm1501_vm10 = vcmp.eq.f32.partialorder %v3229_v40, %v3228_v1  ;;  %v1719_v5 = vsel %vm1269_vm4, %v1718_v54, inf }
0x1b56   : > { %v1502_v56 = vsel %vm1501_vm10, %v2878_v42, 5.0 }
0x1b57   : > { %1378 = vmin.xlane.f32.xlu0 %v1377_v45  ;;  %v1503_v45 = vsel %vm1269_vm4, %v1502_v56, inf }
0x1b58   : > { %1657 = vmin.xlane.f32.xlu1 %v1656_v20  ;;  %v1610_v20 = vsel %vm1609_vm11, %v2878_v42, 5.0 }
0x1b59   : > { %v1611_v18 = vsel %vm1269_vm4, %v1610_v20, inf }
0x1b5b   : > { %1432 = vmin.xlane.f32.xlu0 %v1431_v57  ;;  %v3232_v57 = vld [vmem:[#allocation7_spill] sm:$0xff] }
0x1b5c   : > { %1334 = vmin.xlane.f32.xlu1 %v1333_v37  ;;  %v3233_v37 = vld [vmem:[#allocation4_spill] sm:$0xff] }
0x1b5d   : > { %vm1402_vm13 = vcmp.eq.f32.partialorder %v3233_v37, %v3232_v57 }
0x1b5e   : > { %v1403_v11 = vsel %vm1402_vm13, %v2878_v42, 5.0 }
0x1b5f   : > { %1486 = vmin.xlane.f32.xlu0 %v1485_v27  ;;  %v3234_v27 = vld [vmem:[#allocation15_spill] sm:$0xff]  ;;  %v1404_v8 = vsel %vm1269_vm4, %v1403_v11, inf }
0x1b60   : > { %1450 = vmin.xlane.f32.xlu1 %v1449_v61  ;;  %v3235_v61 = vld [vmem:[#allocation12_spill] sm:$0xff] }
0x1b61   : > { %vm1510_vm14 = vcmp.eq.f32.partialorder %v3235_v61, %v3234_v27 }
0x1b62   : > { %v1511_v3 = vsel %vm1510_vm14, %v2878_v42, 5.0 }
0x1b63   : > { %1540 = vmin.xlane.f32.xlu0 %v1539_v19  ;;  %v1512_v19 = vsel %vm1269_vm4, %v1511_v3, inf }
0x1b64   : > { %1558 = vmin.xlane.f32.xlu1 %v1557_v41  ;;  %v1619_v41 = vsel %vm1618_vm15, %v2878_v42, 5.0 }
0x1b65   : > { %v1620_v2 = vsel %vm1269_vm4, %v1619_v41, inf }
0x1b67   : > { %1594 = vmin.xlane.f32.xlu0 %v1593_v30  ;;  %v1728_v30 = vsel %vm1269_vm4, %v1727_v39, inf }
0x1b68   : > { %1666 = vmin.xlane.f32.xlu1 %v1665_v9  ;;  %v1296_v9 = vpop.xlane.xlu1 %1295 }
0x1b6b   : > { %1648 = vmin.xlane.f32.xlu0 %v1647_v7 }
0x1b6c   : > { %1347 = vmin.xlane.f32.xlu1 %v1346_v28  ;;  %v3068_v16 = vpop.xlane.xlu1 %1369 }
0x1b6f   : > { %1702 = vmin.xlane.f32.xlu0 %v1701_v47 }
0x1b70   : > { %1459 = vmin.xlane.f32.xlu1 %v1458_v58  ;;  %v1424_v48 = vpop.xlane.xlu1 %1423 }
0x1b73   : > { %1387 = vmin.xlane.f32.xlu0 %v1386_v17 }
0x1b74   : > { %1567 = vmin.xlane.f32.xlu1 %v1566_v59  ;;  %v3070_v43 = vpop.xlane.xlu1 %1477 }
0x1b77   : > { %1495 = vmin.xlane.f32.xlu0 %v1494_v13 }
0x1b78   : > { %1675 = vmin.xlane.f32.xlu1 %v1674_v22  ;;  %v1532_v14 = vpop.xlane.xlu1 %1531 }
0x1b7b   : > { %1603 = vmin.xlane.f32.xlu0 %v1602_v50 }
0x1b7c   : > { %v3072_v7 = vpop.xlane.xlu1 %1585 }
0x1b7f   : > { %1711 = vmin.xlane.f32.xlu0 %v1710_v4 }
0x1b80   : > { %v1640_v28 = vpop.xlane.xlu1 %1639 }
0x1b83   : > { %1396 = vmin.xlane.f32.xlu0 %v1395_v26 }
0x1b87   : > { %1504 = vmin.xlane.f32.xlu0 %v1503_v45 }
0x1b8b   : > { %1612 = vmin.xlane.f32.xlu0 %v1611_v18 }
0x1b8f   : > { %1720 = vmin.xlane.f32.xlu0 %v1719_v5 }
0x1b93   : > { %1405 = vmin.xlane.f32.xlu0 %v1404_v8 }
0x1b97   : > { %1513 = vmin.xlane.f32.xlu0 %v1512_v19 }
0x1b9b   : > { %1621 = vmin.xlane.f32.xlu0 %v1620_v2 }
0x1b9f   : > { %1729 = vmin.xlane.f32.xlu0 %v1728_v30 }
0x1bd5   : > { %v3075_v34 = vpop.xlane.xlu1 %1693 }
0x1bd9   : > { %v1322_v29 = vpop.xlane.xlu1 %1321 }
0x1bdd   : > { %v1442_v35 = vpop.xlane.xlu1 %1441 }
0x1be0   : > { %v1759_v0 = vpop.xlane.xlu0 %1758 }
0x1be1   : > { %vm1760_vm1 = vcmp.eq.f32.partialorder %v2952_v63, %v1759_v0  ;;  %1765 = vst.msk [vmem:[%s392_s12] sm:$0xff] %vm1349_vm6, %v1759_v0  ;;  %v1550_v60 = vpop.xlane.xlu1 %1549  ;;  %v1350_v63 = vsel %vm1349_vm6, %v1296_v9, %v1309_v10 }
0x1be2   : > { %v1761_v31 = vsel %vm1760_vm1, %v2878_v42, 5.0  ;;  %v1352_v51 = vsel %vm1351_vm7, %v1350_v63, %v1322_v29 }
0x1be3   : > { %v1762_v21 = vsel %vm1269_vm4, %v1761_v31, inf }
0x1be4   : > { %v1379_v47 = vpop.xlane.xlu0 %1378  ;;  %1763 = vmin.xlane.f32.xlu1 %v1762_v21 }
0x1be5   : > { %v1658_v58 = vpop.xlane.xlu1 %1657  ;;  %v1407_v30 = vsel %vm1349_vm6, %v3068_v16, %v1379_v47 }
0x1be8   : > { %v1433_v12 = vpop.xlane.xlu0 %1432 }
0x1be9   : > { %v1335_v36 = vpop.xlane.xlu1 %1334  ;;  %v1461_v42 = vsel %vm1349_vm6, %v1424_v48, %v1433_v12 }
0x1bea   : > { %v1354_v25 = vsel %vm1353_vm8, %v1352_v51, %v1335_v36  ;;  %v1462_v15 = vsel %vm1351_vm7, %v1461_v42, %v1442_v35 }
0x1bec   : > { %v1487_v55 = vpop.xlane.xlu0 %1486 }
0x1bed   : > { %v1451_v23 = vpop.xlane.xlu1 %1450  ;;  %v1515_v29 = vsel %vm1349_vm6, %v3070_v43, %v1487_v55 }
0x1bee   : > { %v1463_v49 = vsel %vm1353_vm8, %v1462_v15, %v1451_v23 }
0x1bf0   : > { %v1541_v24 = vpop.xlane.xlu0 %1540 }
0x1bf1   : > { %v1559_v17 = vpop.xlane.xlu1 %1558  ;;  %v1569_v38 = vsel %vm1349_vm6, %v1532_v14, %v1541_v24 }
0x1bf2   : > { %v1570_v1 = vsel %vm1351_vm7, %v1569_v38, %v1550_v60 }
0x1bf3   : > { %v1571_v6 = vsel %vm1353_vm8, %v1570_v1, %v1559_v17 }
0x1bf4   : > { %v1595_v59 = vpop.xlane.xlu0 %1594 }
0x1bf5   : > { %v1667_v46 = vpop.xlane.xlu1 %1666  ;;  %v1623_v21 = vsel %vm1349_vm6, %v3072_v7, %v1595_v59 }
0x1bf8   : > { %v1649_v44 = vpop.xlane.xlu0 %1648 }
0x1bf9   : > { %v1348_v13 = vpop.xlane.xlu1 %1347  ;;  %v1677_v26 = vsel %vm1349_vm6, %v1640_v28, %v1649_v44 }
0x1bfa   : > { %v1356_v22 = vsel %vm1355_vm9, %v1354_v25, %v1348_v13  ;;  %v1678_v18 = vsel %vm1351_vm7, %v1677_v26, %v1658_v58 }
0x1bfb   : > { %v2098_v50 = vtrunc.f32 %v1356_v22  ;;  %v1679_v11 = vsel %vm1353_vm8, %v1678_v18, %v1667_v46 }
0x1bfc   : > { %v1703_v62 = vpop.xlane.xlu0 %1702 }
0x1bfd   : > { %v2099_v4 = vcvt.f32.s32 %v2098_v50  ;;  %v1460_v33 = vpop.xlane.xlu1 %1459  ;;  %v1731_v23 = vsel %vm1349_vm6, %v3075_v34, %v1703_v62 }
0x1bfe   : > { %v1464_v40 = vsel %vm1355_vm9, %v1463_v49, %v1460_v33 }
0x1bff   : > { %1748 = vst.msk [vmem:[%s3102_s18] sm:$0xff] %vm1269_vm4, %v2099_v4  ;;  %v2102_v56 = vtrunc.f32 %v1464_v40 }
0x1c00   : > { %v1388_v52 = vpop.xlane.xlu0 %1387 }
0x1c01   : > { %v2103_v45 = vcvt.f32.s32 %v2102_v56  ;;  %v1568_v20 = vpop.xlane.xlu1 %1567  ;;  %v1408_v9 = vsel %vm1351_vm7, %v1407_v30, %v1388_v52 }
0x1c02   : > { %v1572_v54 = vsel %vm1355_vm9, %v1571_v6, %v1568_v20 }
0x1c03   : > { %1750 = vst.msk [vmem:[%s3102_s18 + $0x10] sm:$0xff] %vm1269_vm4, %v2103_v45  ;;  %v2106_v57 = vtrunc.f32 %v1572_v54 }
0x1c04   : > { %v1496_v37 = vpop.xlane.xlu0 %1495 }
0x1c05   : > { %v2107_v5 = vcvt.f32.s32 %v2106_v57  ;;  %v1676_v27 = vpop.xlane.xlu1 %1675  ;;  %v1516_v35 = vsel %vm1351_vm7, %v1515_v29, %v1496_v37 }
0x1c06   : > { %v1680_v61 = vsel %vm1355_vm9, %v1679_v11, %v1676_v27 }
0x1c07   : > { %1752 = vst.msk [vmem:[%s3102_s18 + $0x20] sm:$0xff] %vm1269_vm4, %v2107_v5  ;;  %v2110_v8 = vtrunc.f32 %v1680_v61 }
0x1c08   : > { %v1604_v3 = vpop.xlane.xlu0 %1603 }
0x1c09   : > { %v2111_v32 = vcvt.f32.s32 %v2110_v8  ;;  %v1624_v58 = vsel %vm1351_vm7, %v1623_v21, %v1604_v3 }
0x1c0b   : > { %1754 = vst.msk [vmem:[%s3102_s18 + $0x30] sm:$0xff] %vm1269_vm4, %v2111_v32 }
0x1c0c   : > { %v1712_v53 = vpop.xlane.xlu0 %1711 }
0x1c0d   : > { %v1732_v24 = vsel %vm1351_vm7, %v1731_v23, %v1712_v53 }
0x1c10   : > { %v1397_v19 = vpop.xlane.xlu0 %1396 }
0x1c11   : > { %v1409_v48 = vsel %vm1353_vm8, %v1408_v9, %v1397_v19 }
0x1c14   : > { %v1505_v41 = vpop.xlane.xlu0 %1504 }
0x1c15   : > { %v1517_v0 = vsel %vm1353_vm8, %v1516_v35, %v1505_v41 }
0x1c18   : > { %v1613_v2 = vpop.xlane.xlu0 %1612 }
0x1c19   : > { %v1625_v43 = vsel %vm1353_vm8, %v1624_v58, %v1613_v2 }
0x1c1c   : > { %v1721_v39 = vpop.xlane.xlu0 %1720 }
0x1c1d   : > { %v1733_v17 = vsel %vm1353_vm8, %v1732_v24, %v1721_v39 }
0x1c20   : > { %v1406_v14 = vpop.xlane.xlu0 %1405 }
0x1c21   : > { %v1410_v28 = vsel %vm1355_vm9, %v1409_v48, %v1406_v14 }
0x1c22   : > { %v2100_v10 = vtrunc.f32 %v1410_v28 }
0x1c24   : > { %v2101_v60 = vcvt.f32.s32 %v2100_v10  ;;  %v1514_v31 = vpop.xlane.xlu0 %1513 }
0x1c25   : > { %v1518_v16 = vsel %vm1355_vm9, %v1517_v0, %v1514_v31 }
0x1c26   : > { %1749 = vst.msk [vmem:[%s3102_s18 + $0x8] sm:$0xff] %vm1269_vm4, %v2101_v60  ;;  %v2104_v47 = vtrunc.f32 %v1518_v16 }
0x1c28   : > { %v2105_v12 = vcvt.f32.s32 %v2104_v47  ;;  %v1622_v36 = vpop.xlane.xlu0 %1621 }
0x1c29   : > { %v1626_v55 = vsel %vm1355_vm9, %v1625_v43, %v1622_v36 }
0x1c2a   : > { %1751 = vst.msk [vmem:[%s3102_s18 + $0x18] sm:$0xff] %vm1269_vm4, %v2105_v12  ;;  %v2108_v7 = vtrunc.f32 %v1626_v55 }
0x1c2c   : > { %v2109_v59 = vcvt.f32.s32 %v2108_v7  ;;  %v1730_v46 = vpop.xlane.xlu0 %1729 }
0x1c2d   : > { %v1734_v63 = vsel %vm1355_vm9, %v1733_v17, %v1730_v46 }
0x1c2e   : > { %1753 = vst.msk [vmem:[%s3102_s18 + $0x28] sm:$0xff] %vm1269_vm4, %v2109_v59  ;;  %v2112_v51 = vtrunc.f32 %v1734_v63 }
0x1c30   : > { %v2113_v44 = vcvt.f32.s32 %v2112_v51 }
0x1c32   : > { %1755 = vst.msk [vmem:[%s3102_s18 + $0x38] sm:$0xff] %vm1269_vm4, %v2113_v44 }
0x1c71   : > { %v1764_v42 = vpop.xlane.xlu1 %1763 }
0x1c72   : > { %v2114_v25 = vtrunc.f32 %v1764_v42 }
0x1c74   : > { %v2115_v34 = vcvt.f32.s32 %v2114_v25 }
0x1c76   : > { %1767 = vst.msk [vmem:[%s396_s20] sm:$0xff] %vm1349_vm6, %v2115_v34 }
0x1c77 PF: > { %s21_s13 = sadd.s32 1, %s2231_s13  }
0x1c78   : > { %p18_p5 = scmp.ge.s32.totalorder %s21_s13, 4  }
0x1c7a   :  { %20 = sbr.rel (!%p18_p5) target bundleno = 1 (0x1), region = 114 }

</bundles_post_ra>
